<compile_context>
chip_gen: v7x
topology: tpu7x:2x2x1
jax: 0.10.0
libtpu: 0.0.40
codegen_flags: <defaults>
</compile_context>

<pallas_src>
import jax
import jax.numpy as jnp
from jax.experimental import pallas as pl
from jax.experimental.pallas import tpu as pltpu

BN_EPS = 1e-5
LRELU_SLOPE = 0.01              # nn.LeakyReLU default
VMEM_LIMIT = 32 * 1024 * 1024   # conservative: v7x has only 64 MiB physical


def _round_up(x, m):
    return (x + m - 1) // m * m


# ------------------------------------------------------------------ kernels
def make_conv_tap_kernel(Hq, Ho, Wo, Wo8, Cinp, Coutp):
    """3x3 / stride-2 / pad-1 conv as 9 tap matmuls over parity planes.

    p_ref   : (1, 4*Hq, Wq_pad, Cinp) bf16  parity planes of padded input
    w_ref   : (9, Cinp, Coutp)        bf16  per-tap weight matrices (resident)
    y_ref   : (1, Ho*Wo8, Coutp)      bf16  raw (bias-free) conv output
    sum/sq  : (1, 1, Coutp)           f32   per-image partial BN statistics
    acc_ref : (Ho*Wo8, Coutp)         f32   VMEM accumulator
    """
    Mb = Ho * Wo8

    def kernel(p_ref, w_ref, y_ref, sum_ref, sq_ref, acc_ref):
        acc_ref[...] = jnp.zeros_like(acc_ref)
        for kh in range(3):
            h0 = kh // 2
            for kw in range(3):
                w0 = kw // 2
                t = (kh % 2) * 2 + (kw % 2)           # parity plane index
                tap = p_ref[0, t * Hq + h0: t * Hq + h0 + Ho,
                            w0: w0 + Wo8, :]           # (Ho, Wo8, Cinp) bf16
                lhs = tap.reshape(Mb, Cinp)
                acc_ref[...] += jnp.dot(lhs, w_ref[kh * 3 + kw],
                                        preferred_element_type=jnp.float32)
        y = acc_ref[...]
        y_ref[...] = y.astype(y_ref.dtype).reshape(y_ref.shape)

        # Only the width round-up columns (Wo..Wo8) can contain junk values
        # (everything else that is padding multiplies zeros); mask them out of
        # the statistics.  Static python branch -> no cost when Wo8 == Wo.
        if Wo8 != Wo:
            col = jax.lax.broadcasted_iota(jnp.int32, (Mb, 1), 0) % Wo8
            y = jnp.where(col < Wo, y, 0.0)
        sum_ref[...] = jnp.sum(y, axis=0, keepdims=True).reshape(sum_ref.shape)
        sq_ref[...] = jnp.sum(y * y, axis=0, keepdims=True).reshape(sq_ref.shape)

    return kernel


def fused_linear_kernel(l_ref, x_ref, u_ref, w1_ref, w2_ref, w3_ref, b_ref, o_ref):
    # cat([latent, x, u], 1) @ W.T + b  ==  sum of three dots (no concat in HBM).
    acc = jnp.dot(l_ref[...], w1_ref[...], preferred_element_type=jnp.float32)
    acc = acc + jnp.dot(x_ref[...], w2_ref[...], preferred_element_type=jnp.float32)
    acc = acc + jnp.dot(u_ref[...], w3_ref[...], preferred_element_type=jnp.float32)
    o_ref[...] = acc + b_ref[...]


# ------------------------------------------------------------------ glue
def build_parity_planes(act_nhwc, Wo8):
    """Spatial zero-pad (pad=1) + 2x2 parity split, width-padded for the kernel.

    act_nhwc : (B, Hi, Wi, Cp) with Cp already 128-padded (padded channels == 0).
    Returns    (B, 4*Hq, Wq_pad, Cp) bf16 with plane t = 2*(row parity)+(col parity):
               planes[b, t*Hq + hq, wq, c] = padded_act[b, 2*hq + t//2, 2*wq + t%2, c]
    XLA fuses the caller's folded-BN + LeakyReLU elementwise math into this
    gather, so the activation is only streamed once here.
    """
    B, Hi, Wi, Cp = act_nhwc.shape
    assert Hi % 2 == 0 and Wi % 2 == 0
    a = jnp.pad(act_nhwc, ((0, 0), (1, 1), (1, 1), (0, 0)))
    planes = jnp.concatenate(
        [a[:, 0::2, 0::2, :], a[:, 0::2, 1::2, :],
         a[:, 1::2, 0::2, :], a[:, 1::2, 1::2, :]], axis=1)
    Wq = (Wi + 2) // 2
    Wq_pad = Wo8 + 1
    if Wq_pad > Wq:
        planes = jnp.pad(planes, ((0, 0), (0, 0), (0, Wq_pad - Wq), (0, 0)))
    return planes.astype(jnp.bfloat16)


def conv_bn_stats_pallas(planes, w_all, Ho, Wo, Wo8):
    """One conv layer: 9-tap MXU accumulation + per-image BN partial stats."""
    B = planes.shape[0]
    Hq = planes.shape[1] // 4
    Wq_pad = planes.shape[2]
    Cinp = planes.shape[3]
    Coutp = w_all.shape[2]
    Mb = Ho * Wo8

    y, psum, psq = pl.pallas_call(
        make_conv_tap_kernel(Hq, Ho, Wo, Wo8, Cinp, Coutp),
        out_shape=(
            jax.ShapeDtypeStruct((B, Mb, Coutp), jnp.bfloat16),   # raw conv out
            jax.ShapeDtypeStruct((B, 1, Coutp), jnp.float32),     # partial sum
            jax.ShapeDtypeStruct((B, 1, Coutp), jnp.float32),     # partial sumsq
        ),
        grid_spec=pltpu.PrefetchScalarGridSpec(
            num_scalar_prefetch=0,
            grid=(B,),
            in_specs=[
                pl.BlockSpec((1, 4 * Hq, Wq_pad, Cinp), lambda b: (b, 0, 0, 0)),
                # Resident weight: constant index map, single-buffered.
                pl.BlockSpec((9, Cinp, Coutp), lambda b: (0, 0, 0),
                             pipeline_mode=pl.Buffered(1)),
            ],
            out_specs=(
                pl.BlockSpec((1, Mb, Coutp), lambda b: (b, 0, 0)),
                pl.BlockSpec((1, 1, Coutp), lambda b: (b, 0, 0)),
                pl.BlockSpec((1, 1, Coutp), lambda b: (b, 0, 0)),
            ),
            scratch_shapes=[pltpu.VMEM((Mb, Coutp), jnp.float32)],
        ),
        compiler_params=pltpu.CompilerParams(
            dimension_semantics=("parallel",),      # per-image, safe to split
            vmem_limit_bytes=VMEM_LIMIT),
    )(planes, w_all)
    return y, psum, psq


def _pad2d(a, rows, cols, dtype):
    return jnp.zeros((rows, cols), dtype).at[:a.shape[0], :a.shape[1]].set(
        a.astype(dtype))


def pallas_encoder_latent(latent, x, u, w_pt, b_pt):
    """Fused cat([latent, x, u], 1) + nn.Linear (PyTorch weight (out, in))."""
    B, F1 = latent.shape
    d_x, d_u = x.shape[1], u.shape[1]
    out_dim = w_pt.shape[0]

    Bp = _round_up(B, 8)
    Op = _round_up(out_dim, 128)
    F1p = _round_up(F1, 128)
    dxp = _round_up(d_x, 128)
    dup = _round_up(d_u, 128)

    w1 = w_pt[:, :F1].T                      # (F1, out)
    w2 = w_pt[:, F1:F1 + d_x].T              # (d_x, out)
    w3 = w_pt[:, F1 + d_x:].T                # (d_u, out)

    lat_p = _pad2d(latent, Bp, F1p, jnp.bfloat16)
    x_p = _pad2d(x, Bp, dxp, jnp.bfloat16)
    u_p = _pad2d(u, Bp, dup, jnp.bfloat16)
    w1_p = _pad2d(w1, F1p, Op, jnp.bfloat16)
    w2_p = _pad2d(w2, dxp, Op, jnp.bfloat16)
    w3_p = _pad2d(w3, dup, Op, jnp.bfloat16)
    b_p = jnp.zeros((1, Op), jnp.float32).at[0, :out_dim].set(
        b_pt.astype(jnp.float32))

    out = pl.pallas_call(
        fused_linear_kernel,
        out_shape=jax.ShapeDtypeStruct((Bp, Op), jnp.float32),
        in_specs=[pl.BlockSpec(memory_space=pltpu.MemorySpace.VMEM)] * 7,
        out_specs=pl.BlockSpec(memory_space=pltpu.MemorySpace.VMEM),
        compiler_params=pltpu.CompilerParams(vmem_limit_bytes=VMEM_LIMIT),
    )(lat_p, x_p, u_p, w1_p, w2_p, w3_p, b_p)
    return out[:B, :out_dim]


# ------------------------------------------------------------------ model
def init_vae_params(key, in_channels, n_control, latent_dim, hidden_dims):
    params = {"encoder": []}
    c_in = in_channels
    for h in hidden_dims:
        key, kw, kb = jax.random.split(key, 3)
        params["encoder"].append({
            # Conv bias is kept for structural fidelity; it cancels inside
            # training-mode BatchNorm so the forward output never uses it.
            "w": 0.1 * jax.random.normal(kw, (h, c_in, 3, 3), jnp.float32),
            "b": 0.1 * jax.random.normal(kb, (h,), jnp.float32),
            "gamma": jnp.ones((h,), jnp.float32),   # BatchNorm2d default init
            "beta": jnp.zeros((h,), jnp.float32),
        })
        c_in = h
    feat = hidden_dims[-1] * 16 + latent_dim + n_control
    key, kw, kb = jax.random.split(key, 3)
    params["encoder_latent"] = {
        "w": 0.1 * jax.random.normal(kw, (latent_dim, feat), jnp.float32),
        "b": 0.1 * jax.random.normal(kb, (latent_dim,), jnp.float32),
    }
    return params


def vae_forward(params, i_img, x, u):
    """Matches VAE.forward(i, x, u): encoder -> flatten(NCHW) -> cat -> Linear."""
    B, Cin, H, W = i_img.shape
    act = jnp.transpose(i_img, (0, 2, 3, 1))                 # NCHW -> NHWC once
    Cp0 = _round_up(Cin, 128)
    act = jnp.pad(act, ((0, 0), (0, 0), (0, 0), (0, Cp0 - Cin)))

    Hi, Wi = H, W
    n_layers = len(params["encoder"])
    latent = None
    for li, layer in enumerate(params["encoder"]):
        w_pt = layer["w"]                                     # (Cout, Cin_l, 3, 3)
        Cout, Cin_l = w_pt.shape[0], w_pt.shape[1]
        Cinp = act.shape[-1]
        Coutp = _round_up(Cout, 128)
        Ho, Wo = Hi // 2, Wi // 2
        Wo8 = _round_up(Wo, 8)                                # lane/tile-friendly M

        planes = build_parity_planes(act, Wo8)

        # Per-tap weight matrices (kh, kw) -> (9, Cinp, Coutp), zero-padded.
        w_all = jnp.zeros((9, Cinp, Coutp), jnp.bfloat16)
        w_all = w_all.at[:, :Cin_l, :Cout].set(
            w_pt.transpose(2, 3, 1, 0).reshape(9, Cin_l, Cout).astype(jnp.bfloat16))

        y, psum, psq = conv_bn_stats_pallas(planes, w_all, Ho, Wo, Wo8)

        # Global BatchNorm batch statistics (training mode, biased variance),
        # folded into a single per-channel scale/shift (f32).  The conv bias
        # cancels: (y + b) - mean(y + b) == y - mean(y).
        m_real = B * Ho * Wo
        csum = jnp.sum(psum, axis=0)                          # (1, Coutp)
        csq = jnp.sum(psq, axis=0)
        mean = csum / m_real
        var = jnp.maximum(csq / m_real - mean * mean, 0.0)
        gamma_p = jnp.zeros((1, Coutp), jnp.float32).at[0, :Cout].set(
            layer["gamma"].astype(jnp.float32))
        beta_p = jnp.zeros((1, Coutp), jnp.float32).at[0, :Cout].set(
            layer["beta"].astype(jnp.float32))
        scale = gamma_p * jax.lax.rsqrt(var + BN_EPS)
        shift = beta_p - mean * scale

        # Folded BN + LeakyReLU in f32; padded channels have scale==shift==0 so
        # they stay exactly zero.  XLA fuses this into the next layer's plane
        # construction / the final NCHW flatten (no standalone elementwise pass).
        y4 = y.reshape(B, Ho, Wo8, Coutp).astype(jnp.float32)
        z = y4 * scale.reshape(1, 1, 1, Coutp) + shift.reshape(1, 1, 1, Coutp)
        z = jnp.where(z >= 0, z, LRELU_SLOPE * z)

        if li < n_layers - 1:
            act = z[:, :, :Wo, :]         # keep 128-padded channel axis
            Hi, Wi = Ho, Wo
        else:
            # PyTorch .view(B, -1) flattens NCHW -> transpose before flattening.
            last = z[:, :, :Wo, :Cout]
            latent = jnp.transpose(last, (0, 3, 1, 2)).reshape(B, -1)

    return pallas_encoder_latent(
        latent, x, u,
        params["encoder_latent"]["w"], params["encoder_latent"]["b"])


# ------------------------------------------------------------------ main
if __name__ == "__main__":
    # Small config: 2 encoder blocks so 16x16 input -> 8x8 -> 4x4 (the "*16"
    # flatten the module's encoder_latent expects).
    in_channels, n_control, latent_dim = 3, 2, 8
    hidden_dims = [8, 16]
    B, H, W = 2, 16, 16

    key = jax.random.PRNGKey(0)
    kp, ki, kx, ku = jax.random.split(key, 4)
    params = init_vae_params(kp, in_channels, n_control, latent_dim, hidden_dims)

    i_img = jax.random.normal(ki, (B, in_channels, H, W), jnp.float32)
    x = jax.random.normal(kx, (B, latent_dim), jnp.float32)
    u = jax.random.normal(ku, (B, n_control), jnp.float32)

    fwd = jax.jit(vae_forward)
    out = fwd(params, i_img, x, u)
    jax.block_until_ready(out)
    assert out.shape == (B, latent_dim), out.shape
    print("KERNEL_OK")
</pallas_src>

<mosaic_0001>
module attributes {stable_mosaic.version = 11 : i64} {
  func.func @kernel(%arg0: i32, %arg1: memref<1x36x9x128xbf16, #tpu.memory_space<vmem>>, %arg2: memref<9x128x128xbf16, #tpu.memory_space<vmem>>, %arg3: memref<1x64x128xbf16, #tpu.memory_space<vmem>>, %arg4: memref<1x1x128xf32, #tpu.memory_space<vmem>>, %arg5: memref<1x1x128xf32, #tpu.memory_space<vmem>>, %arg6: memref<64x128xf32, #tpu.memory_space<vmem>>) attributes {dimension_semantics = [#tpu.dimension_semantics<parallel>], iteration_bounds = array<i64: 2>, scalar_prefetch = 0 : i64, scratch_operands = 1 : i64, tpu.core_type = #tpu.core_type<tc>, window_params = [{transform_indices = @transform_0, window_bounds = array<i64: 1, 36, 9, 128>}, {pipeline_mode = #tpu.pipeline_mode<synchronous>, transform_indices = @transform_1, window_bounds = array<i64: 9, 128, 128>}, {transform_indices = @transform_2, window_bounds = array<i64: 1, 64, 128>}, {transform_indices = @transform_3, window_bounds = array<i64: 1, 1, 128>}, {transform_indices = @transform_4, window_bounds = array<i64: 1, 1, 128>}]} {
    %cst = arith.constant 0.000000e+00 : f32
    %0 = vector.broadcast %cst : f32 to vector<64x128xf32>
    %c0 = arith.constant 0 : index
    %c0_0 = arith.constant 0 : index
    %1 = vector.load %arg6[%c0, %c0_0] : memref<64x128xf32, #tpu.memory_space<vmem>>, vector<64x128xf32>
    tpu.vector_store %arg6[%c0, %c0_0], %0 {strides = array<i32>} : memref<64x128xf32, #tpu.memory_space<vmem>>, vector<64x128xf32>,
    %c0_1 = arith.constant 0 : index
    %c0_2 = arith.constant 0 : index
    %c0_3 = arith.constant 0 : index
    %c0_4 = arith.constant 0 : index
    %2 = vector.load %arg1[%c0_1, %c0_2, %c0_3, %c0_4] : memref<1x36x9x128xbf16, #tpu.memory_space<vmem>>, vector<1x8x8x128xbf16>
    %3 = vector.shape_cast %2 : vector<1x8x8x128xbf16> to vector<8x8x128xbf16>
    %4 = vector.shape_cast %3 : vector<8x8x128xbf16> to vector<64x128xbf16>
    %c0_5 = arith.constant 0 : index
    %c0_6 = arith.constant 0 : index
    %5 = vector.load %arg6[%c0_5, %c0_6] : memref<64x128xf32, #tpu.memory_space<vmem>>, vector<64x128xf32>
    %c0_7 = arith.constant 0 : index
    %c0_8 = arith.constant 0 : index
    %c0_9 = arith.constant 0 : index
    %6 = vector.load %arg2[%c0_7, %c0_8, %c0_9] : memref<9x128x128xbf16, #tpu.memory_space<vmem>>, vector<1x128x128xbf16>
    %7 = vector.shape_cast %6 : vector<1x128x128xbf16> to vector<128x128xbf16>
    %cst_10 = arith.constant dense<0.000000e+00> : vector<64x128xf32>
    %8 = tpu.matmul %4, %7, %cst_10 {dimension_numbers = #tpu.dot_dimension_numbers<[1], [0], [0], [1], [0, 0, 1, 1], [], []>} : vector<64x128xbf16>, vector<128x128xbf16>, vector<64x128xf32> -> vector<64x128xf32>
    %9 = arith.addf %5, %8 : vector<64x128xf32>
    %c0_11 = arith.constant 0 : index
    %c0_12 = arith.constant 0 : index
    %10 = vector.load %arg6[%c0_11, %c0_12] : memref<64x128xf32, #tpu.memory_space<vmem>>, vector<64x128xf32>
    tpu.vector_store %arg6[%c0_11, %c0_12], %9 {strides = array<i32>} : memref<64x128xf32, #tpu.memory_space<vmem>>, vector<64x128xf32>,
    %c0_13 = arith.constant 0 : index
    %c9 = arith.constant 9 : index
    %c0_14 = arith.constant 0 : index
    %c0_15 = arith.constant 0 : index
    %11 = vector.load %arg1[%c0_13, %c9, %c0_14, %c0_15] : memref<1x36x9x128xbf16, #tpu.memory_space<vmem>>, vector<1x8x8x128xbf16>
    %12 = vector.shape_cast %11 : vector<1x8x8x128xbf16> to vector<8x8x128xbf16>
    %13 = vector.shape_cast %12 : vector<8x8x128xbf16> to vector<64x128xbf16>
    %c0_16 = arith.constant 0 : index
    %c0_17 = arith.constant 0 : index
    %14 = vector.load %arg6[%c0_16, %c0_17] : memref<64x128xf32, #tpu.memory_space<vmem>>, vector<64x128xf32>
    %c1 = arith.constant 1 : index
    %c0_18 = arith.constant 0 : index
    %c0_19 = arith.constant 0 : index
    %15 = vector.load %arg2[%c1, %c0_18, %c0_19] : memref<9x128x128xbf16, #tpu.memory_space<vmem>>, vector<1x128x128xbf16>
    %16 = vector.shape_cast %15 : vector<1x128x128xbf16> to vector<128x128xbf16>
    %cst_20 = arith.constant dense<0.000000e+00> : vector<64x128xf32>
    %17 = tpu.matmul %13, %16, %cst_20 {dimension_numbers = #tpu.dot_dimension_numbers<[1], [0], [0], [1], [0, 0, 1, 1], [], []>} : vector<64x128xbf16>, vector<128x128xbf16>, vector<64x128xf32> -> vector<64x128xf32>
    %18 = arith.addf %14, %17 : vector<64x128xf32>
    %c0_21 = arith.constant 0 : index
    %c0_22 = arith.constant 0 : index
    %19 = vector.load %arg6[%c0_21, %c0_22] : memref<64x128xf32, #tpu.memory_space<vmem>>, vector<64x128xf32>
    tpu.vector_store %arg6[%c0_21, %c0_22], %18 {strides = array<i32>} : memref<64x128xf32, #tpu.memory_space<vmem>>, vector<64x128xf32>,
    %c0_23 = arith.constant 0 : index
    %c0_24 = arith.constant 0 : index
    %c1_25 = arith.constant 1 : index
    %c0_26 = arith.constant 0 : index
    %20 = vector.load %arg1[%c0_23, %c0_24, %c1_25, %c0_26] : memref<1x36x9x128xbf16, #tpu.memory_space<vmem>>, vector<1x8x8x128xbf16>
    %21 = vector.shape_cast %20 : vector<1x8x8x128xbf16> to vector<8x8x128xbf16>
    %22 = vector.shape_cast %21 : vector<8x8x128xbf16> to vector<64x128xbf16>
    %c0_27 = arith.constant 0 : index
    %c0_28 = arith.constant 0 : index
    %23 = vector.load %arg6[%c0_27, %c0_28] : memref<64x128xf32, #tpu.memory_space<vmem>>, vector<64x128xf32>
    %c2 = arith.constant 2 : index
    %c0_29 = arith.constant 0 : index
    %c0_30 = arith.constant 0 : index
    %24 = vector.load %arg2[%c2, %c0_29, %c0_30] : memref<9x128x128xbf16, #tpu.memory_space<vmem>>, vector<1x128x128xbf16>
    %25 = vector.shape_cast %24 : vector<1x128x128xbf16> to vector<128x128xbf16>
    %cst_31 = arith.constant dense<0.000000e+00> : vector<64x128xf32>
    %26 = tpu.matmul %22, %25, %cst_31 {dimension_numbers = #tpu.dot_dimension_numbers<[1], [0], [0], [1], [0, 0, 1, 1], [], []>} : vector<64x128xbf16>, vector<128x128xbf16>, vector<64x128xf32> -> vector<64x128xf32>
    %27 = arith.addf %23, %26 : vector<64x128xf32>
    %c0_32 = arith.constant 0 : index
    %c0_33 = arith.constant 0 : index
    %28 = vector.load %arg6[%c0_32, %c0_33] : memref<64x128xf32, #tpu.memory_space<vmem>>, vector<64x128xf32>
    tpu.vector_store %arg6[%c0_32, %c0_33], %27 {strides = array<i32>} : memref<64x128xf32, #tpu.memory_space<vmem>>, vector<64x128xf32>,
    %c0_34 = arith.constant 0 : index
    %c18 = arith.constant 18 : index
    %c0_35 = arith.constant 0 : index
    %c0_36 = arith.constant 0 : index
    %29 = vector.load %arg1[%c0_34, %c18, %c0_35, %c0_36] : memref<1x36x9x128xbf16, #tpu.memory_space<vmem>>, vector<1x8x8x128xbf16>
    %30 = vector.shape_cast %29 : vector<1x8x8x128xbf16> to vector<8x8x128xbf16>
    %31 = vector.shape_cast %30 : vector<8x8x128xbf16> to vector<64x128xbf16>
    %c0_37 = arith.constant 0 : index
    %c0_38 = arith.constant 0 : index
    %32 = vector.load %arg6[%c0_37, %c0_38] : memref<64x128xf32, #tpu.memory_space<vmem>>, vector<64x128xf32>
    %c3 = arith.constant 3 : index
    %c0_39 = arith.constant 0 : index
    %c0_40 = arith.constant 0 : index
    %33 = vector.load %arg2[%c3, %c0_39, %c0_40] : memref<9x128x128xbf16, #tpu.memory_space<vmem>>, vector<1x128x128xbf16>
    %34 = vector.shape_cast %33 : vector<1x128x128xbf16> to vector<128x128xbf16>
    %cst_41 = arith.constant dense<0.000000e+00> : vector<64x128xf32>
    %35 = tpu.matmul %31, %34, %cst_41 {dimension_numbers = #tpu.dot_dimension_numbers<[1], [0], [0], [1], [0, 0, 1, 1], [], []>} : vector<64x128xbf16>, vector<128x128xbf16>, vector<64x128xf32> -> vector<64x128xf32>
    %36 = arith.addf %32, %35 : vector<64x128xf32>
    %c0_42 = arith.constant 0 : index
    %c0_43 = arith.constant 0 : index
    %37 = vector.load %arg6[%c0_42, %c0_43] : memref<64x128xf32, #tpu.memory_space<vmem>>, vector<64x128xf32>
    tpu.vector_store %arg6[%c0_42, %c0_43], %36 {strides = array<i32>} : memref<64x128xf32, #tpu.memory_space<vmem>>, vector<64x128xf32>,
    %c0_44 = arith.constant 0 : index
    %c27 = arith.constant 27 : index
    %c0_45 = arith.constant 0 : index
    %c0_46 = arith.constant 0 : index
    %38 = vector.load %arg1[%c0_44, %c27, %c0_45, %c0_46] : memref<1x36x9x128xbf16, #tpu.memory_space<vmem>>, vector<1x8x8x128xbf16>
    %39 = vector.shape_cast %38 : vector<1x8x8x128xbf16> to vector<8x8x128xbf16>
    %40 = vector.shape_cast %39 : vector<8x8x128xbf16> to vector<64x128xbf16>
    %c0_47 = arith.constant 0 : index
    %c0_48 = arith.constant 0 : index
    %41 = vector.load %arg6[%c0_47, %c0_48] : memref<64x128xf32, #tpu.memory_space<vmem>>, vector<64x128xf32>
    %c4 = arith.constant 4 : index
    %c0_49 = arith.constant 0 : index
    %c0_50 = arith.constant 0 : index
    %42 = vector.load %arg2[%c4, %c0_49, %c0_50] : memref<9x128x128xbf16, #tpu.memory_space<vmem>>, vector<1x128x128xbf16>
    %43 = vector.shape_cast %42 : vector<1x128x128xbf16> to vector<128x128xbf16>
    %cst_51 = arith.constant dense<0.000000e+00> : vector<64x128xf32>
    %44 = tpu.matmul %40, %43, %cst_51 {dimension_numbers = #tpu.dot_dimension_numbers<[1], [0], [0], [1], [0, 0, 1, 1], [], []>} : vector<64x128xbf16>, vector<128x128xbf16>, vector<64x128xf32> -> vector<64x128xf32>
    %45 = arith.addf %41, %44 : vector<64x128xf32>
    %c0_52 = arith.constant 0 : index
    %c0_53 = arith.constant 0 : index
    %46 = vector.load %arg6[%c0_52, %c0_53] : memref<64x128xf32, #tpu.memory_space<vmem>>, vector<64x128xf32>
    tpu.vector_store %arg6[%c0_52, %c0_53], %45 {strides = array<i32>} : memref<64x128xf32, #tpu.memory_space<vmem>>, vector<64x128xf32>,
    %c0_54 = arith.constant 0 : index
    %c18_55 = arith.constant 18 : index
    %c1_56 = arith.constant 1 : index
    %c0_57 = arith.constant 0 : index
    %47 = vector.load %arg1[%c0_54, %c18_55, %c1_56, %c0_57] : memref<1x36x9x128xbf16, #tpu.memory_space<vmem>>, vector<1x8x8x128xbf16>
    %48 = vector.shape_cast %47 : vector<1x8x8x128xbf16> to vector<8x8x128xbf16>
    %49 = vector.shape_cast %48 : vector<8x8x128xbf16> to vector<64x128xbf16>
    %c0_58 = arith.constant 0 : index
    %c0_59 = arith.constant 0 : index
    %50 = vector.load %arg6[%c0_58, %c0_59] : memref<64x128xf32, #tpu.memory_space<vmem>>, vector<64x128xf32>
    %c5 = arith.constant 5 : index
    %c0_60 = arith.constant 0 : index
    %c0_61 = arith.constant 0 : index
    %51 = vector.load %arg2[%c5, %c0_60, %c0_61] : memref<9x128x128xbf16, #tpu.memory_space<vmem>>, vector<1x128x128xbf16>
    %52 = vector.shape_cast %51 : vector<1x128x128xbf16> to vector<128x128xbf16>
    %cst_62 = arith.constant dense<0.000000e+00> : vector<64x128xf32>
    %53 = tpu.matmul %49, %52, %cst_62 {dimension_numbers = #tpu.dot_dimension_numbers<[1], [0], [0], [1], [0, 0, 1, 1], [], []>} : vector<64x128xbf16>, vector<128x128xbf16>, vector<64x128xf32> -> vector<64x128xf32>
    %54 = arith.addf %50, %53 : vector<64x128xf32>
    %c0_63 = arith.constant 0 : index
    %c0_64 = arith.constant 0 : index
    %55 = vector.load %arg6[%c0_63, %c0_64] : memref<64x128xf32, #tpu.memory_space<vmem>>, vector<64x128xf32>
    tpu.vector_store %arg6[%c0_63, %c0_64], %54 {strides = array<i32>} : memref<64x128xf32, #tpu.memory_space<vmem>>, vector<64x128xf32>,
    %c0_65 = arith.constant 0 : index
    %c1_66 = arith.constant 1 : index
    %c0_67 = arith.constant 0 : index
    %c0_68 = arith.constant 0 : index
    %56 = vector.load %arg1[%c0_65, %c1_66, %c0_67, %c0_68] : memref<1x36x9x128xbf16, #tpu.memory_space<vmem>>, vector<1x8x8x128xbf16>
    %57 = vector.shape_cast %56 : vector<1x8x8x128xbf16> to vector<8x8x128xbf16>
    %58 = vector.shape_cast %57 : vector<8x8x128xbf16> to vector<64x128xbf16>
    %c0_69 = arith.constant 0 : index
    %c0_70 = arith.constant 0 : index
    %59 = vector.load %arg6[%c0_69, %c0_70] : memref<64x128xf32, #tpu.memory_space<vmem>>, vector<64x128xf32>
    %c6 = arith.constant 6 : index
    %c0_71 = arith.constant 0 : index
    %c0_72 = arith.constant 0 : index
    %60 = vector.load %arg2[%c6, %c0_71, %c0_72] : memref<9x128x128xbf16, #tpu.memory_space<vmem>>, vector<1x128x128xbf16>
    %61 = vector.shape_cast %60 : vector<1x128x128xbf16> to vector<128x128xbf16>
    %cst_73 = arith.constant dense<0.000000e+00> : vector<64x128xf32>
    %62 = tpu.matmul %58, %61, %cst_73 {dimension_numbers = #tpu.dot_dimension_numbers<[1], [0], [0], [1], [0, 0, 1, 1], [], []>} : vector<64x128xbf16>, vector<128x128xbf16>, vector<64x128xf32> -> vector<64x128xf32>
    %63 = arith.addf %59, %62 : vector<64x128xf32>
    %c0_74 = arith.constant 0 : index
    %c0_75 = arith.constant 0 : index
    %64 = vector.load %arg6[%c0_74, %c0_75] : memref<64x128xf32, #tpu.memory_space<vmem>>, vector<64x128xf32>
    tpu.vector_store %arg6[%c0_74, %c0_75], %63 {strides = array<i32>} : memref<64x128xf32, #tpu.memory_space<vmem>>, vector<64x128xf32>,
    %c0_76 = arith.constant 0 : index
    %c10 = arith.constant 10 : index
    %c0_77 = arith.constant 0 : index
    %c0_78 = arith.constant 0 : index
    %65 = vector.load %arg1[%c0_76, %c10, %c0_77, %c0_78] : memref<1x36x9x128xbf16, #tpu.memory_space<vmem>>, vector<1x8x8x128xbf16>
    %66 = vector.shape_cast %65 : vector<1x8x8x128xbf16> to vector<8x8x128xbf16>
    %67 = vector.shape_cast %66 : vector<8x8x128xbf16> to vector<64x128xbf16>
    %c0_79 = arith.constant 0 : index
    %c0_80 = arith.constant 0 : index
    %68 = vector.load %arg6[%c0_79, %c0_80] : memref<64x128xf32, #tpu.memory_space<vmem>>, vector<64x128xf32>
    %c7 = arith.constant 7 : index
    %c0_81 = arith.constant 0 : index
    %c0_82 = arith.constant 0 : index
    %69 = vector.load %arg2[%c7, %c0_81, %c0_82] : memref<9x128x128xbf16, #tpu.memory_space<vmem>>, vector<1x128x128xbf16>
    %70 = vector.shape_cast %69 : vector<1x128x128xbf16> to vector<128x128xbf16>
    %cst_83 = arith.constant dense<0.000000e+00> : vector<64x128xf32>
    %71 = tpu.matmul %67, %70, %cst_83 {dimension_numbers = #tpu.dot_dimension_numbers<[1], [0], [0], [1], [0, 0, 1, 1], [], []>} : vector<64x128xbf16>, vector<128x128xbf16>, vector<64x128xf32> -> vector<64x128xf32>
    %72 = arith.addf %68, %71 : vector<64x128xf32>
    %c0_84 = arith.constant 0 : index
    %c0_85 = arith.constant 0 : index
    %73 = vector.load %arg6[%c0_84, %c0_85] : memref<64x128xf32, #tpu.memory_space<vmem>>, vector<64x128xf32>
    tpu.vector_store %arg6[%c0_84, %c0_85], %72 {strides = array<i32>} : memref<64x128xf32, #tpu.memory_space<vmem>>, vector<64x128xf32>,
    %c0_86 = arith.constant 0 : index
    %c1_87 = arith.constant 1 : index
    %c1_88 = arith.constant 1 : index
    %c0_89 = arith.constant 0 : index
    %74 = vector.load %arg1[%c0_86, %c1_87, %c1_88, %c0_89] : memref<1x36x9x128xbf16, #tpu.memory_space<vmem>>, vector<1x8x8x128xbf16>
    %75 = vector.shape_cast %74 : vector<1x8x8x128xbf16> to vector<8x8x128xbf16>
    %76 = vector.shape_cast %75 : vector<8x8x128xbf16> to vector<64x128xbf16>
    %c0_90 = arith.constant 0 : index
    %c0_91 = arith.constant 0 : index
    %77 = vector.load %arg6[%c0_90, %c0_91] : memref<64x128xf32, #tpu.memory_space<vmem>>, vector<64x128xf32>
    %c8 = arith.constant 8 : index
    %c0_92 = arith.constant 0 : index
    %c0_93 = arith.constant 0 : index
    %78 = vector.load %arg2[%c8, %c0_92, %c0_93] : memref<9x128x128xbf16, #tpu.memory_space<vmem>>, vector<1x128x128xbf16>
    %79 = vector.shape_cast %78 : vector<1x128x128xbf16> to vector<128x128xbf16>
    %cst_94 = arith.constant dense<0.000000e+00> : vector<64x128xf32>
    %80 = tpu.matmul %76, %79, %cst_94 {dimension_numbers = #tpu.dot_dimension_numbers<[1], [0], [0], [1], [0, 0, 1, 1], [], []>} : vector<64x128xbf16>, vector<128x128xbf16>, vector<64x128xf32> -> vector<64x128xf32>
    %81 = arith.addf %77, %80 : vector<64x128xf32>
    %c0_95 = arith.constant 0 : index
    %c0_96 = arith.constant 0 : index
    %82 = vector.load %arg6[%c0_95, %c0_96] : memref<64x128xf32, #tpu.memory_space<vmem>>, vector<64x128xf32>
    tpu.vector_store %arg6[%c0_95, %c0_96], %81 {strides = array<i32>} : memref<64x128xf32, #tpu.memory_space<vmem>>, vector<64x128xf32>,
    %c0_97 = arith.constant 0 : index
    %c0_98 = arith.constant 0 : index
    %83 = vector.load %arg6[%c0_97, %c0_98] : memref<64x128xf32, #tpu.memory_space<vmem>>, vector<64x128xf32>
    %84 = arith.truncf %83 : vector<64x128xf32> to vector<64x128xbf16>
    %85 = vector.shape_cast %84 : vector<64x128xbf16> to vector<1x64x128xbf16>
    %c0_99 = arith.constant 0 : index
    %c0_100 = arith.constant 0 : index
    %c0_101 = arith.constant 0 : index
    %86 = vector.load %arg3[%c0_99, %c0_100, %c0_101] : memref<1x64x128xbf16, #tpu.memory_space<vmem>>, vector<1x64x128xbf16>
    tpu.vector_store %arg3[%c0_99, %c0_100, %c0_101], %85 {strides = array<i32>} : memref<1x64x128xbf16, #tpu.memory_space<vmem>>, vector<1x64x128xbf16>,
    %cst_102 = arith.constant dense<0.000000e+00> : vector<128xf32>
    %87 = vector.multi_reduction <add>, %83, %cst_102 [0] : vector<64x128xf32> to vector<128xf32>
    %88 = vector.shape_cast %87 : vector<128xf32> to vector<1x128xf32>
    %89 = vector.shape_cast %88 : vector<1x128xf32> to vector<1x1x128xf32>
    %c0_103 = arith.constant 0 : index
    %c0_104 = arith.constant 0 : index
    %c0_105 = arith.constant 0 : index
    %90 = vector.load %arg4[%c0_103, %c0_104, %c0_105] : memref<1x1x128xf32, #tpu.memory_space<vmem>>, vector<1x1x128xf32>
    tpu.vector_store %arg4[%c0_103, %c0_104, %c0_105], %89 {strides = array<i32>} : memref<1x1x128xf32, #tpu.memory_space<vmem>>, vector<1x1x128xf32>,
    %91 = arith.mulf %83, %83 : vector<64x128xf32>
    %cst_106 = arith.constant dense<0.000000e+00> : vector<128xf32>
    %92 = vector.multi_reduction <add>, %91, %cst_106 [0] : vector<64x128xf32> to vector<128xf32>
    %93 = vector.shape_cast %92 : vector<128xf32> to vector<1x128xf32>
    %94 = vector.shape_cast %93 : vector<1x128xf32> to vector<1x1x128xf32>
    %c0_107 = arith.constant 0 : index
    %c0_108 = arith.constant 0 : index
    %c0_109 = arith.constant 0 : index
    %95 = vector.load %arg5[%c0_107, %c0_108, %c0_109] : memref<1x1x128xf32, #tpu.memory_space<vmem>>, vector<1x1x128xf32>
    tpu.vector_store %arg5[%c0_107, %c0_108, %c0_109], %94 {strides = array<i32>} : memref<1x1x128xf32, #tpu.memory_space<vmem>>, vector<1x1x128xf32>,
    return
  }
  func.func @transform_0(%arg0: i32) -> (i32, i32, i32, i32) {
    %c0_i32 = arith.constant 0 : i32
    %c0_i32_0 = arith.constant 0 : i32
    %c0_i32_1 = arith.constant 0 : i32
    %c0_i32_2 = arith.constant 0 : i32
    return %arg0, %c0_i32, %c0_i32_0, %c0_i32_1 : i32, i32, i32, i32
  }
  func.func @transform_1(%arg0: i32) -> (i32, i32, i32) {
    %c0_i32 = arith.constant 0 : i32
    %c0_i32_0 = arith.constant 0 : i32
    %c0_i32_1 = arith.constant 0 : i32
    %c0_i32_2 = arith.constant 0 : i32
    return %c0_i32, %c0_i32_0, %c0_i32_1 : i32, i32, i32
  }
  func.func @transform_2(%arg0: i32) -> (i32, i32, i32) {
    %c0_i32 = arith.constant 0 : i32
    %c0_i32_0 = arith.constant 0 : i32
    %c0_i32_1 = arith.constant 0 : i32
    return %arg0, %c0_i32, %c0_i32_0 : i32, i32, i32
  }
  func.func @transform_3(%arg0: i32) -> (i32, i32, i32) {
    %c0_i32 = arith.constant 0 : i32
    %c0_i32_0 = arith.constant 0 : i32
    %c0_i32_1 = arith.constant 0 : i32
    return %arg0, %c0_i32, %c0_i32_0 : i32, i32, i32
  }
  func.func @transform_4(%arg0: i32) -> (i32, i32, i32) {
    %c0_i32 = arith.constant 0 : i32
    %c0_i32_0 = arith.constant 0 : i32
    %c0_i32_1 = arith.constant 0 : i32
    return %arg0, %c0_i32, %c0_i32_0 : i32, i32, i32
  }
}

module attributes {stable_mosaic.version = 11 : i64} {
  func.func @kernel(%arg0: i32, %arg1: memref<1x20x9x128xbf16, #tpu.memory_space<vmem>>, %arg2: memref<9x128x128xbf16, #tpu.memory_space<vmem>>, %arg3: memref<1x32x128xbf16, #tpu.memory_space<vmem>>, %arg4: memref<1x1x128xf32, #tpu.memory_space<vmem>>, %arg5: memref<1x1x128xf32, #tpu.memory_space<vmem>>, %arg6: memref<32x128xf32, #tpu.memory_space<vmem>>) attributes {dimension_semantics = [#tpu.dimension_semantics<parallel>], iteration_bounds = array<i64: 2>, scalar_prefetch = 0 : i64, scratch_operands = 1 : i64, tpu.core_type = #tpu.core_type<tc>, window_params = [{transform_indices = @transform_0, window_bounds = array<i64: 1, 20, 9, 128>}, {pipeline_mode = #tpu.pipeline_mode<synchronous>, transform_indices = @transform_1, window_bounds = array<i64: 9, 128, 128>}, {transform_indices = @transform_2, window_bounds = array<i64: 1, 32, 128>}, {transform_indices = @transform_3, window_bounds = array<i64: 1, 1, 128>}, {transform_indices = @transform_4, window_bounds = array<i64: 1, 1, 128>}]} {
    %cst = arith.constant 0.000000e+00 : f32
    %0 = vector.broadcast %cst : f32 to vector<32x128xf32>
    %c0 = arith.constant 0 : index
    %c0_0 = arith.constant 0 : index
    %1 = vector.load %arg6[%c0, %c0_0] : memref<32x128xf32, #tpu.memory_space<vmem>>, vector<32x128xf32>
    tpu.vector_store %arg6[%c0, %c0_0], %0 {strides = array<i32>} : memref<32x128xf32, #tpu.memory_space<vmem>>, vector<32x128xf32>,
    %c0_1 = arith.constant 0 : index
    %c0_2 = arith.constant 0 : index
    %c0_3 = arith.constant 0 : index
    %c0_4 = arith.constant 0 : index
    %2 = vector.load %arg1[%c0_1, %c0_2, %c0_3, %c0_4] : memref<1x20x9x128xbf16, #tpu.memory_space<vmem>>, vector<1x4x8x128xbf16>
    %3 = vector.shape_cast %2 : vector<1x4x8x128xbf16> to vector<4x8x128xbf16>
    %4 = vector.shape_cast %3 : vector<4x8x128xbf16> to vector<32x128xbf16>
    %c0_5 = arith.constant 0 : index
    %c0_6 = arith.constant 0 : index
    %5 = vector.load %arg6[%c0_5, %c0_6] : memref<32x128xf32, #tpu.memory_space<vmem>>, vector<32x128xf32>
    %c0_7 = arith.constant 0 : index
    %c0_8 = arith.constant 0 : index
    %c0_9 = arith.constant 0 : index
    %6 = vector.load %arg2[%c0_7, %c0_8, %c0_9] : memref<9x128x128xbf16, #tpu.memory_space<vmem>>, vector<1x128x128xbf16>
    %7 = vector.shape_cast %6 : vector<1x128x128xbf16> to vector<128x128xbf16>
    %cst_10 = arith.constant dense<0.000000e+00> : vector<32x128xf32>
    %8 = tpu.matmul %4, %7, %cst_10 {dimension_numbers = #tpu.dot_dimension_numbers<[1], [0], [0], [1], [0, 0, 1, 1], [], []>} : vector<32x128xbf16>, vector<128x128xbf16>, vector<32x128xf32> -> vector<32x128xf32>
    %9 = arith.addf %5, %8 : vector<32x128xf32>
    %c0_11 = arith.constant 0 : index
    %c0_12 = arith.constant 0 : index
    %10 = vector.load %arg6[%c0_11, %c0_12] : memref<32x128xf32, #tpu.memory_space<vmem>>, vector<32x128xf32>
    tpu.vector_store %arg6[%c0_11, %c0_12], %9 {strides = array<i32>} : memref<32x128xf32, #tpu.memory_space<vmem>>, vector<32x128xf32>,
    %c0_13 = arith.constant 0 : index
    %c5 = arith.constant 5 : index
    %c0_14 = arith.constant 0 : index
    %c0_15 = arith.constant 0 : index
    %11 = vector.load %arg1[%c0_13, %c5, %c0_14, %c0_15] : memref<1x20x9x128xbf16, #tpu.memory_space<vmem>>, vector<1x4x8x128xbf16>
    %12 = vector.shape_cast %11 : vector<1x4x8x128xbf16> to vector<4x8x128xbf16>
    %13 = vector.shape_cast %12 : vector<4x8x128xbf16> to vector<32x128xbf16>
    %c0_16 = arith.constant 0 : index
    %c0_17 = arith.constant 0 : index
    %14 = vector.load %arg6[%c0_16, %c0_17] : memref<32x128xf32, #tpu.memory_space<vmem>>, vector<32x128xf32>
    %c1 = arith.constant 1 : index
    %c0_18 = arith.constant 0 : index
    %c0_19 = arith.constant 0 : index
    %15 = vector.load %arg2[%c1, %c0_18, %c0_19] : memref<9x128x128xbf16, #tpu.memory_space<vmem>>, vector<1x128x128xbf16>
    %16 = vector.shape_cast %15 : vector<1x128x128xbf16> to vector<128x128xbf16>
    %cst_20 = arith.constant dense<0.000000e+00> : vector<32x128xf32>
    %17 = tpu.matmul %13, %16, %cst_20 {dimension_numbers = #tpu.dot_dimension_numbers<[1], [0], [0], [1], [0, 0, 1, 1], [], []>} : vector<32x128xbf16>, vector<128x128xbf16>, vector<32x128xf32> -> vector<32x128xf32>
    %18 = arith.addf %14, %17 : vector<32x128xf32>
    %c0_21 = arith.constant 0 : index
    %c0_22 = arith.constant 0 : index
    %19 = vector.load %arg6[%c0_21, %c0_22] : memref<32x128xf32, #tpu.memory_space<vmem>>, vector<32x128xf32>
    tpu.vector_store %arg6[%c0_21, %c0_22], %18 {strides = array<i32>} : memref<32x128xf32, #tpu.memory_space<vmem>>, vector<32x128xf32>,
    %c0_23 = arith.constant 0 : index
    %c0_24 = arith.constant 0 : index
    %c1_25 = arith.constant 1 : index
    %c0_26 = arith.constant 0 : index
    %20 = vector.load %arg1[%c0_23, %c0_24, %c1_25, %c0_26] : memref<1x20x9x128xbf16, #tpu.memory_space<vmem>>, vector<1x4x8x128xbf16>
    %21 = vector.shape_cast %20 : vector<1x4x8x128xbf16> to vector<4x8x128xbf16>
    %22 = vector.shape_cast %21 : vector<4x8x128xbf16> to vector<32x128xbf16>
    %c0_27 = arith.constant 0 : index
    %c0_28 = arith.constant 0 : index
    %23 = vector.load %arg6[%c0_27, %c0_28] : memref<32x128xf32, #tpu.memory_space<vmem>>, vector<32x128xf32>
    %c2 = arith.constant 2 : index
    %c0_29 = arith.constant 0 : index
    %c0_30 = arith.constant 0 : index
    %24 = vector.load %arg2[%c2, %c0_29, %c0_30] : memref<9x128x128xbf16, #tpu.memory_space<vmem>>, vector<1x128x128xbf16>
    %25 = vector.shape_cast %24 : vector<1x128x128xbf16> to vector<128x128xbf16>
    %cst_31 = arith.constant dense<0.000000e+00> : vector<32x128xf32>
    %26 = tpu.matmul %22, %25, %cst_31 {dimension_numbers = #tpu.dot_dimension_numbers<[1], [0], [0], [1], [0, 0, 1, 1], [], []>} : vector<32x128xbf16>, vector<128x128xbf16>, vector<32x128xf32> -> vector<32x128xf32>
    %27 = arith.addf %23, %26 : vector<32x128xf32>
    %c0_32 = arith.constant 0 : index
    %c0_33 = arith.constant 0 : index
    %28 = vector.load %arg6[%c0_32, %c0_33] : memref<32x128xf32, #tpu.memory_space<vmem>>, vector<32x128xf32>
    tpu.vector_store %arg6[%c0_32, %c0_33], %27 {strides = array<i32>} : memref<32x128xf32, #tpu.memory_space<vmem>>, vector<32x128xf32>,
    %c0_34 = arith.constant 0 : index
    %c10 = arith.constant 10 : index
    %c0_35 = arith.constant 0 : index
    %c0_36 = arith.constant 0 : index
    %29 = vector.load %arg1[%c0_34, %c10, %c0_35, %c0_36] : memref<1x20x9x128xbf16, #tpu.memory_space<vmem>>, vector<1x4x8x128xbf16>
    %30 = vector.shape_cast %29 : vector<1x4x8x128xbf16> to vector<4x8x128xbf16>
    %31 = vector.shape_cast %30 : vector<4x8x128xbf16> to vector<32x128xbf16>
    %c0_37 = arith.constant 0 : index
    %c0_38 = arith.constant 0 : index
    %32 = vector.load %arg6[%c0_37, %c0_38] : memref<32x128xf32, #tpu.memory_space<vmem>>, vector<32x128xf32>
    %c3 = arith.constant 3 : index
    %c0_39 = arith.constant 0 : index
    %c0_40 = arith.constant 0 : index
    %33 = vector.load %arg2[%c3, %c0_39, %c0_40] : memref<9x128x128xbf16, #tpu.memory_space<vmem>>, vector<1x128x128xbf16>
    %34 = vector.shape_cast %33 : vector<1x128x128xbf16> to vector<128x128xbf16>
    %cst_41 = arith.constant dense<0.000000e+00> : vector<32x128xf32>
    %35 = tpu.matmul %31, %34, %cst_41 {dimension_numbers = #tpu.dot_dimension_numbers<[1], [0], [0], [1], [0, 0, 1, 1], [], []>} : vector<32x128xbf16>, vector<128x128xbf16>, vector<32x128xf32> -> vector<32x128xf32>
    %36 = arith.addf %32, %35 : vector<32x128xf32>
    %c0_42 = arith.constant 0 : index
    %c0_43 = arith.constant 0 : index
    %37 = vector.load %arg6[%c0_42, %c0_43] : memref<32x128xf32, #tpu.memory_space<vmem>>, vector<32x128xf32>
    tpu.vector_store %arg6[%c0_42, %c0_43], %36 {strides = array<i32>} : memref<32x128xf32, #tpu.memory_space<vmem>>, vector<32x128xf32>,
    %c0_44 = arith.constant 0 : index
    %c15 = arith.constant 15 : index
    %c0_45 = arith.constant 0 : index
    %c0_46 = arith.constant 0 : index
    %38 = vector.load %arg1[%c0_44, %c15, %c0_45, %c0_46] : memref<1x20x9x128xbf16, #tpu.memory_space<vmem>>, vector<1x4x8x128xbf16>
    %39 = vector.shape_cast %38 : vector<1x4x8x128xbf16> to vector<4x8x128xbf16>
    %40 = vector.shape_cast %39 : vector<4x8x128xbf16> to vector<32x128xbf16>
    %c0_47 = arith.constant 0 : index
    %c0_48 = arith.constant 0 : index
    %41 = vector.load %arg6[%c0_47, %c0_48] : memref<32x128xf32, #tpu.memory_space<vmem>>, vector<32x128xf32>
    %c4 = arith.constant 4 : index
    %c0_49 = arith.constant 0 : index
    %c0_50 = arith.constant 0 : index
    %42 = vector.load %arg2[%c4, %c0_49, %c0_50] : memref<9x128x128xbf16, #tpu.memory_space<vmem>>, vector<1x128x128xbf16>
    %43 = vector.shape_cast %42 : vector<1x128x128xbf16> to vector<128x128xbf16>
    %cst_51 = arith.constant dense<0.000000e+00> : vector<32x128xf32>
    %44 = tpu.matmul %40, %43, %cst_51 {dimension_numbers = #tpu.dot_dimension_numbers<[1], [0], [0], [1], [0, 0, 1, 1], [], []>} : vector<32x128xbf16>, vector<128x128xbf16>, vector<32x128xf32> -> vector<32x128xf32>
    %45 = arith.addf %41, %44 : vector<32x128xf32>
    %c0_52 = arith.constant 0 : index
    %c0_53 = arith.constant 0 : index
    %46 = vector.load %arg6[%c0_52, %c0_53] : memref<32x128xf32, #tpu.memory_space<vmem>>, vector<32x128xf32>
    tpu.vector_store %arg6[%c0_52, %c0_53], %45 {strides = array<i32>} : memref<32x128xf32, #tpu.memory_space<vmem>>, vector<32x128xf32>,
    %c0_54 = arith.constant 0 : index
    %c10_55 = arith.constant 10 : index
    %c1_56 = arith.constant 1 : index
    %c0_57 = arith.constant 0 : index
    %47 = vector.load %arg1[%c0_54, %c10_55, %c1_56, %c0_57] : memref<1x20x9x128xbf16, #tpu.memory_space<vmem>>, vector<1x4x8x128xbf16>
    %48 = vector.shape_cast %47 : vector<1x4x8x128xbf16> to vector<4x8x128xbf16>
    %49 = vector.shape_cast %48 : vector<4x8x128xbf16> to vector<32x128xbf16>
    %c0_58 = arith.constant 0 : index
    %c0_59 = arith.constant 0 : index
    %50 = vector.load %arg6[%c0_58, %c0_59] : memref<32x128xf32, #tpu.memory_space<vmem>>, vector<32x128xf32>
    %c5_60 = arith.constant 5 : index
    %c0_61 = arith.constant 0 : index
    %c0_62 = arith.constant 0 : index
    %51 = vector.load %arg2[%c5_60, %c0_61, %c0_62] : memref<9x128x128xbf16, #tpu.memory_space<vmem>>, vector<1x128x128xbf16>
    %52 = vector.shape_cast %51 : vector<1x128x128xbf16> to vector<128x128xbf16>
    %cst_63 = arith.constant dense<0.000000e+00> : vector<32x128xf32>
    %53 = tpu.matmul %49, %52, %cst_63 {dimension_numbers = #tpu.dot_dimension_numbers<[1], [0], [0], [1], [0, 0, 1, 1], [], []>} : vector<32x128xbf16>, vector<128x128xbf16>, vector<32x128xf32> -> vector<32x128xf32>
    %54 = arith.addf %50, %53 : vector<32x128xf32>
    %c0_64 = arith.constant 0 : index
    %c0_65 = arith.constant 0 : index
    %55 = vector.load %arg6[%c0_64, %c0_65] : memref<32x128xf32, #tpu.memory_space<vmem>>, vector<32x128xf32>
    tpu.vector_store %arg6[%c0_64, %c0_65], %54 {strides = array<i32>} : memref<32x128xf32, #tpu.memory_space<vmem>>, vector<32x128xf32>,
    %c0_66 = arith.constant 0 : index
    %c1_67 = arith.constant 1 : index
    %c0_68 = arith.constant 0 : index
    %c0_69 = arith.constant 0 : index
    %56 = vector.load %arg1[%c0_66, %c1_67, %c0_68, %c0_69] : memref<1x20x9x128xbf16, #tpu.memory_space<vmem>>, vector<1x4x8x128xbf16>
    %57 = vector.shape_cast %56 : vector<1x4x8x128xbf16> to vector<4x8x128xbf16>
    %58 = vector.shape_cast %57 : vector<4x8x128xbf16> to vector<32x128xbf16>
    %c0_70 = arith.constant 0 : index
    %c0_71 = arith.constant 0 : index
    %59 = vector.load %arg6[%c0_70, %c0_71] : memref<32x128xf32, #tpu.memory_space<vmem>>, vector<32x128xf32>
    %c6 = arith.constant 6 : index
    %c0_72 = arith.constant 0 : index
    %c0_73 = arith.constant 0 : index
    %60 = vector.load %arg2[%c6, %c0_72, %c0_73] : memref<9x128x128xbf16, #tpu.memory_space<vmem>>, vector<1x128x128xbf16>
    %61 = vector.shape_cast %60 : vector<1x128x128xbf16> to vector<128x128xbf16>
    %cst_74 = arith.constant dense<0.000000e+00> : vector<32x128xf32>
    %62 = tpu.matmul %58, %61, %cst_74 {dimension_numbers = #tpu.dot_dimension_numbers<[1], [0], [0], [1], [0, 0, 1, 1], [], []>} : vector<32x128xbf16>, vector<128x128xbf16>, vector<32x128xf32> -> vector<32x128xf32>
    %63 = arith.addf %59, %62 : vector<32x128xf32>
    %c0_75 = arith.constant 0 : index
    %c0_76 = arith.constant 0 : index
    %64 = vector.load %arg6[%c0_75, %c0_76] : memref<32x128xf32, #tpu.memory_space<vmem>>, vector<32x128xf32>
    tpu.vector_store %arg6[%c0_75, %c0_76], %63 {strides = array<i32>} : memref<32x128xf32, #tpu.memory_space<vmem>>, vector<32x128xf32>,
    %c0_77 = arith.constant 0 : index
    %c6_78 = arith.constant 6 : index
    %c0_79 = arith.constant 0 : index
    %c0_80 = arith.constant 0 : index
    %65 = vector.load %arg1[%c0_77, %c6_78, %c0_79, %c0_80] : memref<1x20x9x128xbf16, #tpu.memory_space<vmem>>, vector<1x4x8x128xbf16>
    %66 = vector.shape_cast %65 : vector<1x4x8x128xbf16> to vector<4x8x128xbf16>
    %67 = vector.shape_cast %66 : vector<4x8x128xbf16> to vector<32x128xbf16>
    %c0_81 = arith.constant 0 : index
    %c0_82 = arith.constant 0 : index
    %68 = vector.load %arg6[%c0_81, %c0_82] : memref<32x128xf32, #tpu.memory_space<vmem>>, vector<32x128xf32>
    %c7 = arith.constant 7 : index
    %c0_83 = arith.constant 0 : index
    %c0_84 = arith.constant 0 : index
    %69 = vector.load %arg2[%c7, %c0_83, %c0_84] : memref<9x128x128xbf16, #tpu.memory_space<vmem>>, vector<1x128x128xbf16>
    %70 = vector.shape_cast %69 : vector<1x128x128xbf16> to vector<128x128xbf16>
    %cst_85 = arith.constant dense<0.000000e+00> : vector<32x128xf32>
    %71 = tpu.matmul %67, %70, %cst_85 {dimension_numbers = #tpu.dot_dimension_numbers<[1], [0], [0], [1], [0, 0, 1, 1], [], []>} : vector<32x128xbf16>, vector<128x128xbf16>, vector<32x128xf32> -> vector<32x128xf32>
    %72 = arith.addf %68, %71 : vector<32x128xf32>
    %c0_86 = arith.constant 0 : index
    %c0_87 = arith.constant 0 : index
    %73 = vector.load %arg6[%c0_86, %c0_87] : memref<32x128xf32, #tpu.memory_space<vmem>>, vector<32x128xf32>
    tpu.vector_store %arg6[%c0_86, %c0_87], %72 {strides = array<i32>} : memref<32x128xf32, #tpu.memory_space<vmem>>, vector<32x128xf32>,
    %c0_88 = arith.constant 0 : index
    %c1_89 = arith.constant 1 : index
    %c1_90 = arith.constant 1 : index
    %c0_91 = arith.constant 0 : index
    %74 = vector.load %arg1[%c0_88, %c1_89, %c1_90, %c0_91] : memref<1x20x9x128xbf16, #tpu.memory_space<vmem>>, vector<1x4x8x128xbf16>
    %75 = vector.shape_cast %74 : vector<1x4x8x128xbf16> to vector<4x8x128xbf16>
    %76 = vector.shape_cast %75 : vector<4x8x128xbf16> to vector<32x128xbf16>
    %c0_92 = arith.constant 0 : index
    %c0_93 = arith.constant 0 : index
    %77 = vector.load %arg6[%c0_92, %c0_93] : memref<32x128xf32, #tpu.memory_space<vmem>>, vector<32x128xf32>
    %c8 = arith.constant 8 : index
    %c0_94 = arith.constant 0 : index
    %c0_95 = arith.constant 0 : index
    %78 = vector.load %arg2[%c8, %c0_94, %c0_95] : memref<9x128x128xbf16, #tpu.memory_space<vmem>>, vector<1x128x128xbf16>
    %79 = vector.shape_cast %78 : vector<1x128x128xbf16> to vector<128x128xbf16>
    %cst_96 = arith.constant dense<0.000000e+00> : vector<32x128xf32>
    %80 = tpu.matmul %76, %79, %cst_96 {dimension_numbers = #tpu.dot_dimension_numbers<[1], [0], [0], [1], [0, 0, 1, 1], [], []>} : vector<32x128xbf16>, vector<128x128xbf16>, vector<32x128xf32> -> vector<32x128xf32>
    %81 = arith.addf %77, %80 : vector<32x128xf32>
    %c0_97 = arith.constant 0 : index
    %c0_98 = arith.constant 0 : index
    %82 = vector.load %arg6[%c0_97, %c0_98] : memref<32x128xf32, #tpu.memory_space<vmem>>, vector<32x128xf32>
    tpu.vector_store %arg6[%c0_97, %c0_98], %81 {strides = array<i32>} : memref<32x128xf32, #tpu.memory_space<vmem>>, vector<32x128xf32>,
    %c0_99 = arith.constant 0 : index
    %c0_100 = arith.constant 0 : index
    %83 = vector.load %arg6[%c0_99, %c0_100] : memref<32x128xf32, #tpu.memory_space<vmem>>, vector<32x128xf32>
    %84 = arith.truncf %83 : vector<32x128xf32> to vector<32x128xbf16>
    %85 = vector.shape_cast %84 : vector<32x128xbf16> to vector<1x32x128xbf16>
    %c0_101 = arith.constant 0 : index
    %c0_102 = arith.constant 0 : index
    %c0_103 = arith.constant 0 : index
    %86 = vector.load %arg3[%c0_101, %c0_102, %c0_103] : memref<1x32x128xbf16, #tpu.memory_space<vmem>>, vector<1x32x128xbf16>
    tpu.vector_store %arg3[%c0_101, %c0_102, %c0_103], %85 {strides = array<i32>} : memref<1x32x128xbf16, #tpu.memory_space<vmem>>, vector<1x32x128xbf16>,
    %87 = tpu.iota {dimensions = array<i32: 0>} : vector<32x1xi32>
    %c8_i32 = arith.constant 8 : i32
    %c0_i32 = arith.constant 0 : i32
    %88 = arith.cmpi eq, %c8_i32, %c0_i32 : i32
    %c1_i32 = arith.constant 1 : i32
    %89 = arith.select %88, %c1_i32, %c8_i32 : i32
    %90 = vector.broadcast %89 : i32 to vector<32x1xi32>
    %91 = arith.remsi %87, %90 : vector<32x1xi32>
    %c0_i32_104 = arith.constant 0 : i32
    %92 = vector.broadcast %c0_i32_104 : i32 to vector<32x1xi32>
    %93 = arith.cmpi ne, %91, %92 : vector<32x1xi32>
    %c0_i32_105 = arith.constant 0 : i32
    %94 = vector.broadcast %c0_i32_105 : i32 to vector<32x1xi32>
    %95 = arith.cmpi slt, %91, %94 : vector<32x1xi32>
    %c0_i32_106 = arith.constant 0 : i32
    %96 = arith.cmpi slt, %89, %c0_i32_106 : i32
    %97 = vector.broadcast %96 : i1 to vector<32x1xi1>
    %98 = vector.broadcast %97 : vector<32x1xi1> to vector<32x1xi1>
    %99 = arith.xori %95, %98 : vector<32x1xi1>
    %100 = arith.andi %99, %93 : vector<32x1xi1>
    %101 = vector.broadcast %89 : i32 to vector<32x1xi32>
    %102 = arith.addi %91, %101 : vector<32x1xi32>
    %103 = arith.select %100, %102, %91 : vector<32x1xi1>, vector<32x1xi32>
    %c4_i32 = arith.constant 4 : i32
    %104 = vector.broadcast %c4_i32 : i32 to vector<32x1xi32>
    %105 = arith.cmpi slt, %103, %104 : vector<32x1xi32>
    %cst_107 = arith.constant 0.000000e+00 : f32
    %106 = vector.shape_cast %105 : vector<32x1xi1> to vector<32x1xi1>
    %107 = vector.broadcast %106 : vector<32x1xi1> to vector<32x128xi1>
    %108 = vector.broadcast %cst_107 : f32 to vector<32x128xf32>
    %109 = arith.select %107, %83, %108 : vector<32x128xi1>, vector<32x128xf32>
    %cst_108 = arith.constant dense<0.000000e+00> : vector<128xf32>
    %110 = vector.multi_reduction <add>, %109, %cst_108 [0] : vector<32x128xf32> to vector<128xf32>
    %111 = vector.shape_cast %110 : vector<128xf32> to vector<1x128xf32>
    %112 = vector.shape_cast %111 : vector<1x128xf32> to vector<1x1x128xf32>
    %c0_109 = arith.constant 0 : index
    %c0_110 = arith.constant 0 : index
    %c0_111 = arith.constant 0 : index
    %113 = vector.load %arg4[%c0_109, %c0_110, %c0_111] : memref<1x1x128xf32, #tpu.memory_space<vmem>>, vector<1x1x128xf32>
    tpu.vector_store %arg4[%c0_109, %c0_110, %c0_111], %112 {strides = array<i32>} : memref<1x1x128xf32, #tpu.memory_space<vmem>>, vector<1x1x128xf32>,
    %114 = arith.mulf %109, %109 : vector<32x128xf32>
    %cst_112 = arith.constant dense<0.000000e+00> : vector<128xf32>
    %115 = vector.multi_reduction <add>, %114, %cst_112 [0] : vector<32x128xf32> to vector<128xf32>
    %116 = vector.shape_cast %115 : vector<128xf32> to vector<1x128xf32>
    %117 = vector.shape_cast %116 : vector<1x128xf32> to vector<1x1x128xf32>
    %c0_113 = arith.constant 0 : index
    %c0_114 = arith.constant 0 : index
    %c0_115 = arith.constant 0 : index
    %118 = vector.load %arg5[%c0_113, %c0_114, %c0_115] : memref<1x1x128xf32, #tpu.memory_space<vmem>>, vector<1x1x128xf32>
    tpu.vector_store %arg5[%c0_113, %c0_114, %c0_115], %117 {strides = array<i32>} : memref<1x1x128xf32, #tpu.memory_space<vmem>>, vector<1x1x128xf32>,
    return
  }
  func.func @transform_0(%arg0: i32) -> (i32, i32, i32, i32) {
    %c0_i32 = arith.constant 0 : i32
    %c0_i32_0 = arith.constant 0 : i32
    %c0_i32_1 = arith.constant 0 : i32
    %c0_i32_2 = arith.constant 0 : i32
    return %arg0, %c0_i32, %c0_i32_0, %c0_i32_1 : i32, i32, i32, i32
  }
  func.func @transform_1(%arg0: i32) -> (i32, i32, i32) {
    %c0_i32 = arith.constant 0 : i32
    %c0_i32_0 = arith.constant 0 : i32
    %c0_i32_1 = arith.constant 0 : i32
    %c0_i32_2 = arith.constant 0 : i32
    return %c0_i32, %c0_i32_0, %c0_i32_1 : i32, i32, i32
  }
  func.func @transform_2(%arg0: i32) -> (i32, i32, i32) {
    %c0_i32 = arith.constant 0 : i32
    %c0_i32_0 = arith.constant 0 : i32
    %c0_i32_1 = arith.constant 0 : i32
    return %arg0, %c0_i32, %c0_i32_0 : i32, i32, i32
  }
  func.func @transform_3(%arg0: i32) -> (i32, i32, i32) {
    %c0_i32 = arith.constant 0 : i32
    %c0_i32_0 = arith.constant 0 : i32
    %c0_i32_1 = arith.constant 0 : i32
    return %arg0, %c0_i32, %c0_i32_0 : i32, i32, i32
  }
  func.func @transform_4(%arg0: i32) -> (i32, i32, i32) {
    %c0_i32 = arith.constant 0 : i32
    %c0_i32_0 = arith.constant 0 : i32
    %c0_i32_1 = arith.constant 0 : i32
    return %arg0, %c0_i32, %c0_i32_0 : i32, i32, i32
  }
}

module attributes {stable_mosaic.version = 11 : i64} {
  func.func @fused_linear_kernel(%arg0: memref<8x256xbf16, #tpu.memory_space<vmem>>, %arg1: memref<8x128xbf16, #tpu.memory_space<vmem>>, %arg2: memref<8x128xbf16, #tpu.memory_space<vmem>>, %arg3: memref<256x128xbf16, #tpu.memory_space<vmem>>, %arg4: memref<128x128xbf16, #tpu.memory_space<vmem>>, %arg5: memref<128x128xbf16, #tpu.memory_space<vmem>>, %arg6: memref<1x128xf32, #tpu.memory_space<vmem>>, %arg7: memref<8x128xf32, #tpu.memory_space<vmem>>) attributes {dimension_semantics = [], scalar_prefetch = 0 : i64, scratch_operands = 0 : i64, tpu.core_type = #tpu.core_type<tc>} {
    %c0 = arith.constant 0 : index
    %c0_0 = arith.constant 0 : index
    %0 = vector.load %arg0[%c0, %c0_0] : memref<8x256xbf16, #tpu.memory_space<vmem>>, vector<8x256xbf16>
    %c0_1 = arith.constant 0 : index
    %c0_2 = arith.constant 0 : index
    %1 = vector.load %arg3[%c0_1, %c0_2] : memref<256x128xbf16, #tpu.memory_space<vmem>>, vector<256x128xbf16>
    %cst = arith.constant dense<0.000000e+00> : vector<8x128xf32>
    %2 = tpu.matmul %0, %1, %cst {dimension_numbers = #tpu.dot_dimension_numbers<[1], [0], [0], [1], [0, 0, 1, 1], [], []>} : vector<8x256xbf16>, vector<256x128xbf16>, vector<8x128xf32> -> vector<8x128xf32>
    %c0_3 = arith.constant 0 : index
    %c0_4 = arith.constant 0 : index
    %3 = vector.load %arg1[%c0_3, %c0_4] : memref<8x128xbf16, #tpu.memory_space<vmem>>, vector<8x128xbf16>
    %c0_5 = arith.constant 0 : index
    %c0_6 = arith.constant 0 : index
    %4 = vector.load %arg4[%c0_5, %c0_6] : memref<128x128xbf16, #tpu.memory_space<vmem>>, vector<128x128xbf16>
    %cst_7 = arith.constant dense<0.000000e+00> : vector<8x128xf32>
    %5 = tpu.matmul %3, %4, %cst_7 {dimension_numbers = #tpu.dot_dimension_numbers<[1], [0], [0], [1], [0, 0, 1, 1], [], []>} : vector<8x128xbf16>, vector<128x128xbf16>, vector<8x128xf32> -> vector<8x128xf32>
    %6 = arith.addf %2, %5 : vector<8x128xf32>
    %c0_8 = arith.constant 0 : index
    %c0_9 = arith.constant 0 : index
    %7 = vector.load %arg2[%c0_8, %c0_9] : memref<8x128xbf16, #tpu.memory_space<vmem>>, vector<8x128xbf16>
    %c0_10 = arith.constant 0 : index
    %c0_11 = arith.constant 0 : index
    %8 = vector.load %arg5[%c0_10, %c0_11] : memref<128x128xbf16, #tpu.memory_space<vmem>>, vector<128x128xbf16>
    %cst_12 = arith.constant dense<0.000000e+00> : vector<8x128xf32>
    %9 = tpu.matmul %7, %8, %cst_12 {dimension_numbers = #tpu.dot_dimension_numbers<[1], [0], [0], [1], [0, 0, 1, 1], [], []>} : vector<8x128xbf16>, vector<128x128xbf16>, vector<8x128xf32> -> vector<8x128xf32>
    %10 = arith.addf %6, %9 : vector<8x128xf32>
    %c0_13 = arith.constant 0 : index
    %c0_14 = arith.constant 0 : index
    %11 = vector.load %arg6[%c0_13, %c0_14] : memref<1x128xf32, #tpu.memory_space<vmem>>, vector<1x128xf32>
    %12 = vector.broadcast %11 : vector<1x128xf32> to vector<8x128xf32>
    %13 = arith.addf %10, %12 : vector<8x128xf32>
    %c0_15 = arith.constant 0 : index
    %c0_16 = arith.constant 0 : index
    %14 = vector.load %arg7[%c0_15, %c0_16] : memref<8x128xf32, #tpu.memory_space<vmem>>, vector<8x128xf32>
    tpu.vector_store %arg7[%c0_15, %c0_16], %13 {strides = array<i32>} : memref<8x128xf32, #tpu.memory_space<vmem>>, vector<8x128xf32>,
    return
  }
}

</mosaic_0001>

<bundles_post_ra>
// kernel: vae_forward.3
= control target key start
LH: loop header
LB: loop body
LE: loop exit
PB: predicated region body
PF: predicated region fallthrough
CT: control target
= control target key end

     0   :  { %s3330_s15 = smov 0   ;;  %s3703_s0 = inlined_call_operand.vmem [shape: bf16[2,36,9,128], index: 0, kind: input, shape index: {}]   ;;  %s3704_s1 = inlined_call_operand.vmem [shape: bf16[9,128,128], index: 1, kind: input, shape index: {}]   ;;  %s3705_s2 = inlined_call_operand.vmem [shape: bf16[2,64,128], index: 2, kind: output, shape index: {0}]   ;;  %s3706_s3 = inlined_call_operand.vmem [shape: f32[2,1,128], index: 3, kind: output, shape index: {1}]   ;;  %s3707_s4 = inlined_call_operand.vmem [shape: f32[2,1,128], index: 4, kind: output, shape index: {2}]  }
   0x1 LB: > { %s2430_s16 = sadd.s32 4294967295, %s3303_s15   ;;  %p2434_p0 = scmp.ge.s32.totalorder %s3303_s15, 1  ;;  %s3303_s15 = sphi %s3330_s15, %s15_s15  }
   0x2   : > { %p167_p1 = scmp.lt.s32.totalorder %s3303_s15, 3 }
   0x4   : > { %p168_p2 = pnand %p2434_p0, %p167_p1 }
   0x5   : > { %v3201_v0 = vld [vmem:[%s3704_s1] sm:$0xff] (!%p168_p2)   ;;  %p199_p3 = scmp.lt.s32.totalorder (!%p168_p2), %s2430_s16, 1  ;;  %v3203_v2 = vld [vmem:[%s3704_s1 + $0x8] sm:$0xff] (!%p168_p2)   ;;  %v3205_v4 = vld [vmem:[%s3704_s1 + $0x10] sm:$0xff] (!%p168_p2)   ;;  %vm612_vm0 = vsmask.f32 (!%p168_p2), 3328 }
   0x6   : > { %171 = sbr.rel (%p168_p2) target bundleno = 413 (0x19d), region = 28  ;;  %v3202_v1 = vld [vmem:[%s3704_s1 + $0x100] sm:$0xff] (!%p168_p2)   ;;  %2896 = vmatprep.subr.bf16.mxu1 (!%p168_p2), %v3201_v0  ;;  %v3204_v3 = vld [vmem:[%s3704_s1 + $0x108] sm:$0xff] (!%p168_p2)   ;;  %v3206_v5 = vld [vmem:[%s3704_s1 + $0x110] sm:$0xff] (!%p168_p2)   ;;  %vm613_vm1 = vsmask.f32 (!%p168_p2), 7440 }
   0x7   : > { %2992 = vmatprep.subr.bf16.mxu0 (!%p168_p2), %v3202_v1  ;;  %2897 = vmatpush3.bf16.msra.mxu1 (!%p168_p2), %v3201_v0  ;;  %v3207_v6 = vld [vmem:[%s3704_s1 + $0x18] sm:$0xff] (!%p168_p2)   ;;  %v3209_v8 = vld [vmem:[%s3704_s1 + $0x20] sm:$0xff] (!%p168_p2)   ;;  %v3211_v10 = vld [vmem:[%s3704_s1 + $0x28] sm:$0xff] (!%p168_p2)  }
   0x8   : > { %2993 = vmatpush3.bf16.msra.mxu0 (!%p168_p2), %v3202_v1  ;;  %2898 = vmatprep.subr.bf16.mxu1 (!%p168_p2), %v3203_v2  ;;  %v3208_v7 = vld [vmem:[%s3704_s1 + $0x118] sm:$0xff] (!%p168_p2)   ;;  %v3210_v9 = vld [vmem:[%s3704_s1 + $0x120] sm:$0xff] (!%p168_p2)   ;;  %v3212_v12 = vld [vmem:[%s3704_s1 + $0x128] sm:$0xff] (!%p168_p2)  }
   0x9   : > { %2994 = vmatprep.subr.bf16.mxu0 (!%p168_p2), %v3204_v3  ;;  %v3213_v14 = vld [vmem:[%s3704_s1 + $0x30] sm:$0xff] (!%p168_p2)   ;;  %v3215_v16 = vld [vmem:[%s3704_s1 + $0x38] sm:$0xff] (!%p168_p2)   ;;  %v3218_v18 = vld [vmem:[%s3704_s1 + $0x40] sm:$0xff] (!%p168_p2)  }
   0xa   : > { %v3214_v15 = vld [vmem:[%s3704_s1 + $0x130] sm:$0xff] (!%p168_p2)   ;;  %v3216_v17 = vld [vmem:[%s3704_s1 + $0x138] sm:$0xff] (!%p168_p2)   ;;  %v3220_v19 = vld [vmem:[%s3704_s1 + $0x140] sm:$0xff] (!%p168_p2)  }
   0xb   : > { %2899 = vmatpush3.bf16.msra.mxu1 (!%p168_p2), %v3203_v2  ;;  %v3223_v22 = vld [vmem:[%s3704_s1 + $0x48] sm:$0xff] (!%p168_p2)   ;;  %v3225_v26 = vld [vmem:[%s3704_s1 + $0x50] sm:$0xff] (!%p168_p2)   ;;  %v3227_v28 = vld [vmem:[%s3704_s1 + $0x58] sm:$0xff] (!%p168_p2)  }
   0xc   : > { %2995 = vmatpush3.bf16.msra.mxu0 (!%p168_p2), %v3204_v3  ;;  %2900 = vmatprep.subr.bf16.mxu1 (!%p168_p2), %v3205_v4  ;;  %v3224_v23 = vld [vmem:[%s3704_s1 + $0x148] sm:$0xff] (!%p168_p2)   ;;  %v3226_v27 = vld [vmem:[%s3704_s1 + $0x150] sm:$0xff] (!%p168_p2)   ;;  %v3228_v31 = vld [vmem:[%s3704_s1 + $0x158] sm:$0xff] (!%p168_p2)  }
   0xd   : > { %s3711_s16 = smov (!%p199_p3, %s2430_s16), 1  ;;  %2996 = vmatprep.subr.bf16.mxu0 %v3206_v5  ;;  %v3229_v38 = vld [vmem:[%s3704_s1 + $0x60] sm:$0xff]   ;;  %v3231_v47 = vld [vmem:[%s3704_s1 + $0x68] sm:$0xff]   ;;  %vm3445_vm2 = vmor %vm612_vm0, %vm613_vm1 }
   0xe   : > { %s3192_s7 = smul.u32 288, %s3711_s16  ;;  %v3230_v43 = vld [vmem:[%s3704_s1 + $0x160] sm:$0xff]   ;;  %v3232_v50 = vld [vmem:[%s3704_s1 + $0x168] sm:$0xff]   ;;  %v3234_v2 = vld [vmem:[%s3704_s1 + $0x70] sm:$0xff]   ;;  %s2756_s25 = sshll.u32 %s3711_s16, 5 }
   0xf   : > { %2901 = vmatpush3.bf16.msra.mxu1 %v3205_v4  ;;  %s208_s28 = scalar_lea.vmem %s3705_s2, %s2756_s25  ;;  %s211_s5 = scalar_lea.vmem %s3706_s3, %s3711_s16 }
  0x10   : > { %2997 = vmatpush3.bf16.msra.mxu0 %v3206_v5  ;;  %2902 = vmatprep.subr.bf16.mxu1 %v3207_v6  ;;  %s3374_s14 = scalar_lea.vmem %s3703_s0, %s3192_s7  ;;  %s214_s8 = scalar_lea.vmem %s3707_s4, %s3711_s16 }
  0x11   : > { %2998 = vmatprep.subr.bf16.mxu0 %v3208_v7  ;;  %v3217_v11 = vld [vmem:[%s3374_s14] ss:$8 sps:$4 sm:$0xff]   ;;  %v3221_v20 = vld [vmem:[%s3374_s14 + $0x10] ss:$8 sps:$4 sm:$0xff]   ;;  %v2587_v34 = vld [vmem:[%s3374_s14 + $0x94] sm:$0x1] }
  0x12   : > { %2912 = vmatprep.mubr.bf16.mxu1 %v3217_v11  ;;  %v3219_v13 = vld [vmem:[%s3374_s14 + $0xd8] ss:$8 sps:$4 sm:$0xff]   ;;  %v3222_v21 = vld [vmem:[%s3374_s14 + $0xe8] ss:$8 sps:$4 sm:$0xff]   ;;  %v2589_v39 = vld [vmem:[%s3374_s14 + $0x9c] sm:$0x1] }
  0x13   : > { %2903 = vmatpush3.bf16.msra.mxu1 %v3207_v6  ;;  %3008 = vmatprep.mubr.bf16.mxu0 %v3219_v13  ;;  %v3233_v24 = vld [vmem:[%s3374_s14 + $0x20] ss:$8 sps:$4 sm:$0xff]   ;;  %v3237_v29 = vld [vmem:[%s3374_s14 + $0x30] ss:$8 sps:$4 sm:$0xff]   ;;  %v1297_v40 = vshll.u32 %v2587_v34, 16  ;;  %v1311_v46 = vshll.u32 %v2589_v39, 16 }
  0x14   : > { %2999 = vmatpush3.bf16.msra.mxu0 %v3208_v7  ;;  %2904 = vmatprep.subr.bf16.mxu1 %v3209_v8  ;;  %v3235_v25 = vld [vmem:[%s3374_s14 + $0xf8] ss:$8 sps:$4 sm:$0xff]   ;;  %v3238_v30 = vld [vmem:[%s3374_s14 + $0x108] ss:$8 sps:$4 sm:$0xff]   ;;  %v2591_v57 = vld [vmem:[%s3374_s14 + $0xa4] sm:$0x1] }
  0x15   : > { %3000 = vmatprep.subr.bf16.mxu0 %v3210_v9  ;;  %v3241_v32 = vld [vmem:[%s3374_s14 + $0x48] ss:$8 sps:$4 sm:$0xff]   ;;  %v2588_v35 = vld [vmem:[%s3374_s14 + $0x98] sm:$0xf]  ;;  %v1299_v52 = vrot.slane %v1297_v40, 5  ;;  %v1313_v55 = vrot.slane %v1311_v46, 5 }
  0x16   : > { %v2586_v33 = vld [vmem:[%s3374_s14 + $0x90] sm:$0xf]  ;;  %v1302_v41 = vshrl.u32 %v2588_v35, 16  ;;  %v1305_v42 = vshll.u32 %v2588_v35, 16  ;;  %v2590_v56 = vld [vmem:[%s3374_s14 + $0xa0] sm:$0xf] }
  0x17   : > { %2905 = vmatpush3.bf16.msra.mxu1 %v3209_v8  ;;  %v1288_v36 = vshrl.u32 %v2586_v33, 16  ;;  %v1291_v37 = vshll.u32 %v2586_v33, 16  ;;  %v2592_v59 = vld [vmem:[%s3374_s14 + $0xa8] sm:$0xf]  ;;  %v2593_v60 = vld [vmem:[%s3374_s14 + $0xac] sm:$0x1] }
  0x18   : > { %3001 = vmatpush3.bf16.msra.mxu0 %v3210_v9  ;;  %2906 = vmatprep.subr.bf16.mxu1 %v3211_v10  ;;  %v1304_v48 = vrot.slane %v1302_v41, 4  ;;  %v1307_v49 = vrot.slane %v1305_v42, 5  ;;  %v1316_v61 = vshrl.u32 %v2590_v56, 16  ;;  %v1319_v63 = vshll.u32 %v2590_v56, 16  ;;  %v3236_v6 = vld [vmem:[%s3704_s1 + $0x170] sm:$0xff]  }
  0x19   : > { %3002 = vmatprep.subr.bf16.mxu0 %v3212_v12  ;;  %v1290_v44 = vrot.slane %v1288_v36, 4  ;;  %v1293_v45 = vrot.slane %v1291_v37, 5  ;;  %v1325_v0 = vshll.u32 %v2591_v57, 16  ;;  %v1330_v1 = vshrl.u32 %v2592_v59, 16  ;;  %v3255_v37 = vld [vmem:[%s3374_s14 + $0x68] ss:$8 sps:$4 sm:$0xff]  }
  0x1a   : > { %v1308_v54 = vor.u32 %v1307_v49, %v1304_v48  ;;  %v1318_v4 = vrot.slane %v1316_v61, 4  ;;  %v1333_v5 = vshll.u32 %v2592_v59, 16  ;;  %v1321_v8 = vrot.slane %v1319_v63, 5  ;;  %v3258_v48 = vld [vmem:[%s3374_s14 + $0x78] ss:$8 sps:$4 sm:$0xff]  }
  0x1b   : > { %2907 = vmatpush3.bf16.msra.mxu1 %v3211_v10  ;;  %v1294_v51 = vor.u32 %v1293_v45, %v1290_v44  ;;  %v1332_v9 = vrot.slane %v1330_v1, 4  ;;  %v1339_v10 = vshll.u32 %v2593_v60, 16  ;;  %v2598_v49 = vld [vmem:[%s3374_s14 + $0xc0] sm:$0xf]  ;;  %v3249_v59 = vld [vmem:[%s3704_s1 + $0x98] sm:$0xff]  }
  0x1c   : > { %3003 = vmatpush3.bf16.msra.mxu0 %v3212_v12  ;;  %2908 = vmatprep.subr.bf16.mxu1 %v3213_v14  ;;  %v1309_v62 = vrot.slane %v1308_v54, 4  ;;  %v1327_v12 = vrot.slane %v1325_v0, 5  ;;  %v1335_v13 = vrot.slane %v1333_v5, 5  ;;  %v1372_v56 = vshrl.u32 %v2598_v49, 16 }
  0x1d   : > { %3004 = vmatprep.subr.bf16.mxu0 %v3214_v15  ;;  %v1295_v58 = vrot.slane %v1294_v51, 4  ;;  %v2600_v51 = vld [vmem:[%s3374_s14 + $0xc8] sm:$0xf]  ;;  %v1375_v57 = vshll.u32 %v2598_v49, 16 }
  0x1e   : > { %v1314_v7 = vsel %vm3445_vm2, %v1309_v62, %v1313_v55  ;;  %v2601_v55 = vld [vmem:[%s3374_s14 + $0xcc] sm:$0x1]  ;;  %v1386_v61 = vshrl.u32 %v2600_v51, 16  ;;  %v1389_v62 = vshll.u32 %v2600_v51, 16  ;;  %v1374_v1 = vrot.slane %v1372_v56, 4 }
  0x1f   : > { %2909 = vmatpush3.bf16.msra.mxu1 %v3213_v14  ;;  %v1300_v3 = vsel %vm3445_vm2, %v1295_v58, %v1299_v52  ;;  %v3239_v14 = vld [vmem:[%s3704_s1 + $0x78] sm:$0xff]   ;;  %v3248_v52 = vld [vmem:[%s3704_s1 + $0x190] sm:$0xff]   ;;  %v1395_v63 = vshll.u32 %v2601_v55, 16 }
  0x20   : > { %3005 = vmatpush3.bf16.msra.mxu0 %v3214_v15  ;;  %2910 = vmatprep.subr.bf16.mxu1 %v3215_v16  ;;  %v2618_v11 = vcombine.low %v1300_v3, %v1314_v7  ;;  %v1322_v15 = vor.u32 %v1321_v8, %v1318_v4  ;;  %v3250_v4 = vld [vmem:[%s3704_s1 + $0x198] sm:$0xff]   ;;  %v1391_v7 = vrot.slane %v1389_v62, 5 }
  0x21   : > { %3006 = vmatprep.subr.bf16.mxu0 %v3216_v17  ;;  %v1397_v8 = vrot.slane %v1395_v63, 5 }
  0x23   : > { %2911 = vmatpush3.bf16.msra.mxu1 %v3215_v16  ;;  %v1336_v16 = vor.u32 %v1335_v13, %v1332_v9  ;;  %v3251_v13 = vld [vmem:[%s3704_s1 + $0xa0] sm:$0xff]  }
  0x24   : > { %3007 = vmatpush3.bf16.msra.mxu0 %v3216_v17  ;;  %2920 = vmatprep.subr.bf16.mxu1 %v3218_v18  ;;  %v1323_v17 = vrot.slane %v1322_v15, 4 }
  0x25   : > { %3016 = vmatprep.subr.bf16.mxu0 %v3220_v19 }
  0x26   : > { %2913 = vmatmul.mubr.bf16.vlgmr.msra.gmra.mrb[0].mxu1 %v3221_v20  ;;  %v1337_v20 = vrot.slane %v1336_v16, 4  ;;  %v598_v16 = vld [vmem:[%s3374_s14 + $0x8] sm:$0xf] }
  0x27   : > { %2921 = vmatpush3.bf16.msra.mxu1 %v3218_v18  ;;  %3009 = vmatmul.mubr.bf16.vlgmr.msra.gmra.mrb[0].mxu0 %v3222_v21  ;;  %v1341_v18 = vrot.slane %v1339_v10, 5  ;;  %v3242_v21 = vld [vmem:[%s3704_s1 + $0x80] sm:$0xff]  }
  0x28   : > { %3017 = vmatpush3.bf16.msra.mxu0 %v3220_v19  ;;  %2922 = vmatprep.subr.bf16.mxu1 %v3223_v22  ;;  %v3240_v19 = vld [vmem:[%s3704_s1 + $0x178] sm:$0xff]  }
  0x29   : > { %3018 = vmatprep.subr.bf16.mxu0 %v3224_v23  ;;  %2916 = vmatprep.mubr.bf16.mxu1 %v3233_v24  ;;  %v3243_v24 = vld [vmem:[%s3704_s1 + $0x180] sm:$0xff]  }
  0x2a   : > { %3012 = vmatprep.mubr.bf16.mxu0 %v3235_v25  ;;  %v3244_v25 = vld [vmem:[%s3374_s14 + $0x58] ss:$8 sps:$4 sm:$0xff]  }
  0x2b   : > { %2923 = vmatpush3.bf16.msra.mxu1 %v3223_v22  ;;  %v1328_v22 = vsel %vm3445_vm2, %v1323_v17, %v1327_v12  ;;  %v597_v12 = vld [vmem:[%s3374_s14 + $0x4] sm:$0x1]  ;;  %v599_v17 = vld [vmem:[%s3374_s14 + $0xc] sm:$0x1] }
  0x2c   : > { %3019 = vmatpush3.bf16.msra.mxu0 %v3224_v23  ;;  %2924 = vmatprep.subr.bf16.mxu1 %v3225_v26  ;;  %v1342_v23 = vsel %vm3445_vm2, %v1337_v20, %v1341_v18 }
  0x2d   : > { %3020 = vmatprep.subr.bf16.mxu0 %v3226_v27 }
  0x2e   : > { %2917 = vmatmul.mubr.bf16.gmra.mrb[4].mxu1 %v3237_v29  ;;  %v3246_v29 = vld [vmem:[%s3704_s1 + $0x188] sm:$0xff]  }
  0x2f   : > { %2925 = vmatpush3.bf16.msra.mxu1 %v3225_v26  ;;  %3013 = vmatmul.mubr.bf16.gmra.mrb[4].mxu0 %v3238_v30  ;;  %v3245_v26 = vld [vmem:[%s3704_s1 + $0x88] sm:$0xff]   ;;  %v2595_v30 = vld [vmem:[%s3374_s14 + $0xb4] sm:$0x1] }
  0x30   : > { %3021 = vmatpush3.bf16.msra.mxu0 %v3226_v27  ;;  %2926 = vmatprep.subr.bf16.mxu1 %v3227_v28  ;;  %v2594_v27 = vld [vmem:[%s3374_s14 + $0xb0] sm:$0xf]  ;;  %v1353_v35 = vshll.u32 %v2595_v30, 16 }
  0x31   : > { %3022 = vmatprep.subr.bf16.mxu0 %v3228_v31  ;;  %2936 = vmatprep.mubr.bf16.mxu1 %v3241_v32  ;;  %v2597_v32 = vld [vmem:[%s3374_s14 + $0xbc] sm:$0x1]  ;;  %v1344_v33 = vshrl.u32 %v2594_v27, 16  ;;  %v1347_v34 = vshll.u32 %v2594_v27, 16  ;;  %v639_v27 = vshll.u32 %v599_v17, 16 }
  0x32   : > { %3032 = vmatprep.mubr.bf16.mxu0 %v2618_v11  ;;  %v1367_v39 = vshll.u32 %v2597_v32, 16  ;;  %v1355_v44 = vrot.slane %v1353_v35, 5  ;;  %v596_v11 = vld [vmem:[%s3374_s14] sm:$0xf]  ;;  %v3253_v32 = vld [vmem:[%s3704_s1 + $0xa8] sm:$0xff]  }
  0x33   : > { %2927 = vmatpush3.bf16.msra.mxu1 %v3227_v28  ;;  %v2619_v28 = vcombine.low %v1328_v22, %v1342_v23  ;;  %v1346_v40 = vrot.slane %v1344_v33, 4  ;;  %v1349_v41 = vrot.slane %v1347_v34, 5  ;;  %v616_v18 = vshrl.u32 %v596_v11, 16  ;;  %v607_v17 = vld [vmem:[%s3374_s14 + $0x2c] sm:$0x1] }
  0x34   : > { %3023 = vmatpush3.bf16.msra.mxu0 %v3228_v31  ;;  %2928 = vmatprep.subr.bf16.mxu1 %v3229_v38  ;;  %v2596_v31 = vld [vmem:[%s3374_s14 + $0xb8] sm:$0xf]  ;;  %v1369_v46 = vrot.slane %v1367_v39, 5  ;;  %v630_v22 = vshrl.u32 %v598_v16, 16  ;;  %v633_v23 = vshll.u32 %v598_v16, 16 }
  0x35   : > { %3024 = vmatprep.subr.bf16.mxu0 %v3230_v43  ;;  %v1358_v36 = vshrl.u32 %v2596_v31, 16  ;;  %v606_v16 = vld [vmem:[%s3374_s14 + $0x28] sm:$0xf] }
  0x36   : > { %v632_v30 = vrot.slane %v630_v22, 4  ;;  %v686_v22 = vshrl.u32 %v606_v16, 16 }
  0x37   : > { %2929 = vmatpush3.bf16.msra.mxu1 %v3229_v38  ;;  %v1361_v38 = vshll.u32 %v2596_v31, 16  ;;  %v1360_v42 = vrot.slane %v1358_v36, 4  ;;  %v635_v31 = vrot.slane %v633_v23, 5  ;;  %v641_v36 = vrot.slane %v639_v27, 5 }
  0x38   : > { %3025 = vmatpush3.bf16.msra.mxu0 %v3230_v43  ;;  %2930 = vmatprep.subr.bf16.mxu1 %v3231_v47  ;;  %v3247_v43 = vld [vmem:[%s3704_s1 + $0x90] sm:$0xff]   ;;  %v689_v23 = vshll.u32 %v606_v16, 16  ;;  %v2703_v16 = vld [vmem:[%s3374_s14 + $0xc] sm:$0x1] }
  0x39   : > { %3026 = vmatprep.subr.bf16.mxu0 %v3232_v50  ;;  %v1363_v45 = vrot.slane %v1361_v38, 5  ;;  %v3254_v38 = vld [vmem:[%s3704_s1 + $0x1a8] sm:$0xff]  }
  0x3b   : > { %2931 = vmatpush3.bf16.msra.mxu1 %v3231_v47  ;;  %v1350_v47 = vor.u32 %v1349_v41, %v1346_v40  ;;  %v1364_v54 = vor.u32 %v1363_v45, %v1360_v42  ;;  %v636_v40 = vor.u32 %v635_v31, %v632_v30  ;;  %v600_v41 = vld [vmem:[%s3374_s14 + $0x10] sm:$0xf]  ;;  %v691_v31 = vrot.slane %v689_v23, 5 }
  0x3c   : > { %3027 = vmatpush3.bf16.msra.mxu0 %v3232_v50  ;;  %2932 = vmatprep.subr.bf16.mxu1 %v3234_v2  ;;  %v2599_v50 = vld [vmem:[%s3374_s14 + $0xc4] sm:$0x1]  ;;  %v644_v45 = vshrl.u32 %v600_v41, 16  ;;  %v608_v30 = vld [vmem:[%s3374_s14 + $0x30] sm:$0xf] }
  0x3d   : > { %3028 = vmatprep.subr.bf16.mxu0 %v3236_v6  ;;  %v1381_v58 = vshll.u32 %v2599_v50, 16  ;;  %v1351_v60 = vrot.slane %v1350_v47, 4  ;;  %v1365_v0 = vrot.slane %v1364_v54, 4  ;;  %v603_v47 = vld [vmem:[%s3374_s14 + $0x1c] sm:$0x1] }
  0x3f   : > { %2933 = vmatpush3.bf16.msra.mxu1 %v3234_v2  ;;  %v1377_v2 = vrot.slane %v1375_v57, 5  ;;  %v1383_v3 = vrot.slane %v1381_v58, 5  ;;  %v1356_v5 = vsel %vm3445_vm2, %v1351_v60, %v1355_v44  ;;  %v1370_v9 = vsel %vm3445_vm2, %v1365_v0, %v1369_v46  ;;  %v602_v44 = vld [vmem:[%s3374_s14 + $0x18] sm:$0xf]  ;;  %v3257_v60 = vld [vmem:[%s3704_s1 + $0x1b0] sm:$0xff]  }
  0x40   : > { %3029 = vmatpush3.bf16.msra.mxu0 %v3236_v6  ;;  %2934 = vmatprep.subr.bf16.mxu1 %v3239_v14  ;;  %v1388_v6 = vrot.slane %v1386_v61, 4  ;;  %v637_v46 = vrot.slane %v636_v40, 4  ;;  %v658_v50 = vshrl.u32 %v602_v44, 16  ;;  %v661_v54 = vshll.u32 %v602_v44, 16 }
  0x41   : > { %3030 = vmatprep.subr.bf16.mxu0 %v3240_v19  ;;  %v1378_v10 = vor.u32 %v1377_v2, %v1374_v1  ;;  %v667_v58 = vshll.u32 %v603_v47, 16 }
  0x42   : > { %v1392_v15 = vor.u32 %v1391_v7, %v1388_v6  ;;  %v642_v55 = vsel %vm3445_vm2, %v637_v46, %v641_v36  ;;  %v660_v57 = vrot.slane %v658_v50, 4  ;;  %v663_v63 = vrot.slane %v661_v54, 5  ;;  %v3260_v6 = vld [vmem:[%s3704_s1 + $0x1b8] sm:$0xff]   ;;  %v3261_v7 = vld [vmem:[%s3704_s1 + $0xc0] sm:$0xff]  }
  0x43   : > { %2935 = vmatpush3.bf16.msra.mxu1 %v3239_v14  ;;  %v2620_v14 = vcombine.low %v1356_v5, %v1370_v9  ;;  %v1379_v20 = vrot.slane %v1378_v10, 4  ;;  %v3263_v10 = vld [vmem:[%s3704_s1 + $0x1c0] sm:$0xff]   ;;  %v3269_v50 = vld [vmem:[%s3704_s1 + $0xd8] sm:$0xff]  }
  0x44   : > { %3031 = vmatpush3.bf16.msra.mxu0 %v3240_v19  ;;  %2944 = vmatprep.subr.bf16.mxu1 %v3242_v21  ;;  %v619_v19 = vshll.u32 %v596_v11, 16  ;;  %v664_v1 = vor.u32 %v663_v63, %v660_v57  ;;  %v3264_v11 = vld [vmem:[%s3374_s14 + $0x18] ss:$8 sps:$4 sm:$0xff]  }
  0x45   : > { %3040 = vmatprep.subr.bf16.mxu0 %v3243_v24 }
  0x46   : > { %2937 = vmatmul.mubr.bf16.vlgmr.msra.gmra.mrb[0].mxu1 %v3244_v25  ;;  %v618_v25 = vrot.slane %v616_v18, 4  ;;  %v665_v5 = vrot.slane %v664_v1, 4  ;;  %v3266_v18 = vld [vmem:[%s3704_s1 + $0x1c8] sm:$0xff]   ;;  %v3271_v1 = vld [vmem:[%s3704_s1 + $0xe0] sm:$0xff]  }
  0x47   : > { %2945 = vmatpush3.bf16.msra.mxu1 %v3242_v21  ;;  %3033 = vmatmul.mubr.bf16.vlgmr.msra.gmra.mrb[0].mxu0 %v2619_v28  ;;  %v625_v21 = vshll.u32 %v597_v12, 16  ;;  %v3252_v28 = vld [vmem:[%s3704_s1 + $0x1a0] sm:$0xff]  }
  0x48   : > { %3041 = vmatpush3.bf16.msra.mxu0 %v3243_v24  ;;  %2946 = vmatprep.subr.bf16.mxu1 %v3245_v26  ;;  %v1393_v24 = vrot.slane %v1392_v15, 4  ;;  %v604_v12 = vld [vmem:[%s3374_s14 + $0x20] sm:$0xf]  ;;  %v605_v15 = vld [vmem:[%s3374_s14 + $0x24] sm:$0x1] }
  0x49   : > { %3042 = vmatprep.subr.bf16.mxu0 %v3246_v29  ;;  %2940 = vmatprep.mubr.bf16.mxu1 %v3255_v37  ;;  %v627_v35 = vrot.slane %v625_v21, 5  ;;  %v3262_v37 = vld [vmem:[%s3374_s14 + $0x8] ss:$8 sps:$4 sm:$0xff]   ;;  %v681_v21 = vshll.u32 %v605_v15, 16 }
  0x4a   : > { %3036 = vmatprep.mubr.bf16.mxu0 %v2620_v14  ;;  %v1398_v33 = vsel %vm3445_vm2, %v1393_v24, %v1397_v8  ;;  %v3265_v14 = vld [vmem:[%s3704_s1 + $0xc8] sm:$0xff]   ;;  %v695_v24 = vshll.u32 %v607_v17, 16  ;;  %v2704_v17 = vld [vmem:[%s3374_s14 + $0x10] sm:$0xf] }
  0x4b   : > { %2947 = vmatpush3.bf16.msra.mxu1 %v3245_v26  ;;  %v621_v26 = vrot.slane %v619_v19, 5  ;;  %v672_v19 = vshrl.u32 %v604_v12, 16  ;;  %v2702_v15 = vld [vmem:[%s3374_s14 + $0x8] sm:$0xf]  ;;  %v1977_v23 = vshll.u32 %v2704_v17, 16 }
  0x4c   : > { %3043 = vmatpush3.bf16.msra.mxu0 %v3246_v29  ;;  %2948 = vmatprep.subr.bf16.mxu1 %v3247_v43  ;;  %v1384_v29 = vsel %vm3445_vm2, %v1379_v20, %v1383_v3  ;;  %v669_v3 = vrot.slane %v667_v58, 5  ;;  %v675_v20 = vshll.u32 %v604_v12, 16  ;;  %v3277_v58 = vld [vmem:[%s3374_s14 + $0x38] ss:$8 sps:$4 sm:$0xff]  }
  0x4d   : > { %3044 = vmatprep.subr.bf16.mxu0 %v3248_v52  ;;  %v622_v34 = vor.u32 %v621_v26, %v618_v25  ;;  %v2621_v39 = vcombine.low %v1384_v29, %v1398_v33  ;;  %v3275_v25 = vld [vmem:[%s3374_s14 + $0x28] ss:$8 sps:$4 sm:$0xff]   ;;  %v674_v26 = vrot.slane %v672_v19, 4  ;;  %v688_v29 = vrot.slane %v686_v22, 4  ;;  %v609_v33 = vld [vmem:[%s3374_s14 + $0x34] sm:$0x1] }
  0x4e   : > { %2941 = vmatmul.mubr.bf16.gmra.mrb[4].mxu1 %v3258_v48  ;;  %v647_v48 = vshll.u32 %v600_v41, 16  ;;  %v670_v9 = vsel %vm3445_vm2, %v665_v5, %v669_v3  ;;  %v677_v27 = vrot.slane %v675_v20, 5  ;;  %v709_v40 = vshll.u32 %v609_v33, 16  ;;  %v3268_v41 = vld [vmem:[%s3704_s1 + $0x1d0] sm:$0xff]   ;;  %v3272_v5 = vld [vmem:[%s3704_s1 + $0x1e0] sm:$0xff]   ;;  %v3279_v12 = vld [vmem:[%s3704_s1 + $0xf8] sm:$0xff]  }
  0x4f   : > { %2949 = vmatpush3.bf16.msra.mxu1 %v3247_v43  ;;  %v623_v42 = vrot.slane %v622_v34, 4  ;;  %v601_v43 = vld [vmem:[%s3374_s14 + $0x14] sm:$0x1]  ;;  %3037 = vmatmul.mubr.bf16.gmra.mrb[4].mxu0 %v2621_v39  ;;  %v610_v34 = vld [vmem:[%s3374_s14 + $0x38] sm:$0xf]  ;;  %v703_v39 = vshll.u32 %v608_v30, 16 }
  0x50   : > { %3045 = vmatpush3.bf16.msra.mxu0 %v3248_v52  ;;  %2950 = vmatprep.subr.bf16.mxu1 %v3249_v59  ;;  %v653_v49 = vshll.u32 %v601_v43, 16  ;;  %v646_v52 = vrot.slane %v644_v45, 4  ;;  %v649_v56 = vrot.slane %v647_v48, 5  ;;  %v678_v36 = vor.u32 %v677_v27, %v674_v26  ;;  %v2713_v33 = vld [vmem:[%s3374_s14 + $0x34] sm:$0x1] }
  0x51   : > { %3046 = vmatprep.subr.bf16.mxu0 %v3250_v4  ;;  %v628_v51 = vsel %vm3445_vm2, %v623_v42, %v627_v35  ;;  %3056 = vmatprep.mubr.bf16.mxu0 %v3262_v37  ;;  %v3267_v35 = vld [vmem:[%s3704_s1 + $0xd0] sm:$0xff]   ;;  %v611_v37 = vld [vmem:[%s3374_s14 + $0x3c] sm:$0x1]  ;;  %v692_v42 = vor.u32 %v691_v31, %v688_v29  ;;  %v714_v43 = vshrl.u32 %v610_v34, 16  ;;  %v717_v44 = vshll.u32 %v610_v34, 16 }
  0x52   : > { %v2502_v61 = vcombine.low %v628_v51, %v642_v55  ;;  %v655_v62 = vrot.slane %v653_v49, 5  ;;  %v650_v0 = vor.u32 %v649_v56, %v646_v52  ;;  %v723_v45 = vshll.u32 %v611_v37, 16  ;;  %v2712_v29 = vld [vmem:[%s3374_s14 + $0x30] sm:$0xf]  ;;  %v3284_v34 = vld [vmem:[%s3374_s14 + $0x60] ss:$8 sps:$4 sm:$0xff]  }
  0x53   : > { %2951 = vmatpush3.bf16.msra.mxu1 %v3249_v59  ;;  %v3256_v59 = vld [vmem:[%s3704_s1 + $0xb0] sm:$0xff]   ;;  %v679_v46 = vrot.slane %v678_v36, 4  ;;  %v705_v48 = vrot.slane %v703_v39, 5  ;;  %v711_v49 = vrot.slane %v709_v40, 5  ;;  %v693_v51 = vrot.slane %v692_v42, 4  ;;  %v3286_v39 = vld [vmem:[%s3704_s1 + $0x208] sm:$0xff]  }
  0x54   : > { %3047 = vmatpush3.bf16.msra.mxu0 %v3250_v4  ;;  %2952 = vmatprep.subr.bf16.mxu1 %v3251_v13  ;;  %v651_v2 = vrot.slane %v650_v0, 4  ;;  %v3259_v4 = vld [vmem:[%s3704_s1 + $0xb8] sm:$0xff]   ;;  %v716_v52 = vrot.slane %v714_v43, 4  ;;  %v719_v54 = vrot.slane %v717_v44, 5  ;;  %v725_v55 = vrot.slane %v723_v45, 5 }
  0x55   : > { %3048 = vmatprep.subr.bf16.mxu0 %v3252_v28  ;;  %2960 = vmatprep.mubr.bf16.mxu1 %v2502_v61  ;;  %v3270_v61 = vld [vmem:[%s3704_s1 + $0x1d8] sm:$0xff]   ;;  %v1960_v19 = vshrl.u32 %v2702_v15, 16  ;;  %v1963_v20 = vshll.u32 %v2702_v15, 16  ;;  %v1974_v22 = vshrl.u32 %v2704_v17, 16  ;;  %v2033_v42 = vshll.u32 %v2712_v29, 16  ;;  %v3293_v15 = vld [vmem:[%s3704_s1 + $0x220] sm:$0xff]  }
  0x56   : > { %v656_v8 = vsel %vm3445_vm2, %v651_v2, %v655_v62  ;;  %v2039_v43 = vshll.u32 %v2713_v33, 16  ;;  %v3287_v44 = vld [vmem:[%s3374_s14 + $0xb0] ss:$8 sps:$4 sm:$0xff]  }
  0x57   : > { %2953 = vmatpush3.bf16.msra.mxu1 %v3251_v13  ;;  %v2503_v13 = vcombine.low %v656_v8, %v670_v9  ;;  %v3273_v8 = vld [vmem:[%s3704_s1 + $0xe8] sm:$0xff]   ;;  %v1962_v26 = vrot.slane %v1960_v19, 4  ;;  %v1965_v27 = vrot.slane %v1963_v20, 5  ;;  %v1976_v31 = vrot.slane %v1974_v22, 4 }
  0x58   : > { %3049 = vmatpush3.bf16.msra.mxu0 %v3252_v28  ;;  %2954 = vmatprep.subr.bf16.mxu1 %v3253_v32  ;;  %v683_v28 = vrot.slane %v681_v21, 5  ;;  %v3274_v9 = vld [vmem:[%s3704_s1 + $0x1e8] sm:$0xff]   ;;  %v1969_v21 = vshll.u32 %v2703_v16, 16 }
  0x59   : > { %3050 = vmatprep.subr.bf16.mxu0 %v3254_v38  ;;  %v3294_v20 = vld [vmem:[%s3704_s1 + $0x228] sm:$0xff]  }
  0x5a   : > { %v684_v56 = vsel %vm3445_vm2, %v679_v46, %v683_v28  ;;  %v2711_v28 = vld [vmem:[%s3374_s14 + $0x2c] sm:$0x1]  ;;  %v1971_v45 = vrot.slane %v1969_v21, 5  ;;  %v2715_v21 = vld [vmem:[%s3374_s14 + $0x3c] sm:$0x1] }
  0x5b   : > { %2955 = vmatpush3.bf16.msra.mxu1 %v3253_v32  ;;  %v697_v32 = vrot.slane %v695_v24, 5 }
  0x5c   : > { %3051 = vmatpush3.bf16.msra.mxu0 %v3254_v38  ;;  %2956 = vmatprep.subr.bf16.mxu1 %v3256_v59  ;;  %v700_v38 = vshrl.u32 %v608_v30, 16  ;;  %v3283_v30 = vld [vmem:[%s3374_s14 + $0xa0] ss:$8 sps:$4 sm:$0xff]  }
  0x5d   : > { %3052 = vmatprep.subr.bf16.mxu0 %v3257_v60 }
  0x5e   : > { %v702_v47 = vrot.slane %v700_v38, 4  ;;  %v2025_v38 = vshll.u32 %v2711_v28, 16 }
  0x5f   : > { %2957 = vmatpush3.bf16.msra.mxu1 %v3256_v59  ;;  %v698_v59 = vsel %vm3445_vm2, %v693_v51, %v697_v32  ;;  %v1979_v32 = vrot.slane %v1977_v23, 5 }
  0x60   : > { %3053 = vmatpush3.bf16.msra.mxu0 %v3257_v60  ;;  %2958 = vmatprep.subr.bf16.mxu1 %v3259_v4  ;;  %v706_v57 = vor.u32 %v705_v48, %v702_v47  ;;  %v720_v60 = vor.u32 %v719_v54, %v716_v52  ;;  %v2504_v62 = vcombine.low %v684_v56, %v698_v59  ;;  %v2035_v54 = vrot.slane %v2033_v42, 5 }
  0x61   : > { %3054 = vmatprep.subr.bf16.mxu0 %v3260_v6  ;;  %v1980_v40 = vor.u32 %v1979_v32, %v1976_v31  ;;  %v2027_v56 = vrot.slane %v2025_v38, 5  ;;  %v2041_v59 = vrot.slane %v2039_v43, 5  ;;  %v2707_v31 = vld [vmem:[%s3374_s14 + $0x1c] sm:$0x1]  ;;  %v2709_v32 = vld [vmem:[%s3374_s14 + $0x24] sm:$0x1] }
  0x62   : > { %v707_v63 = vrot.slane %v706_v57, 4  ;;  %v721_v0 = vrot.slane %v720_v60, 4  ;;  %v3291_v57 = vld [vmem:[%s3704_s1 + $0x210] sm:$0xff]  }
  0x63   : > { %2959 = vmatpush3.bf16.msra.mxu1 %v3259_v4  ;;  %v3282_v4 = vld [vmem:[%s3374_s14 + $0x50] ss:$8 sps:$4 sm:$0xff]   ;;  %v1981_v51 = vrot.slane %v1980_v40, 4 }
  0x64   : > { %3055 = vmatpush3.bf16.msra.mxu0 %v3260_v6  ;;  %2968 = vmatprep.subr.bf16.mxu1 %v3261_v7  ;;  %v712_v2 = vsel %vm3445_vm2, %v707_v63, %v711_v49  ;;  %v726_v3 = vsel %vm3445_vm2, %v721_v0, %v725_v55  ;;  %v3288_v49 = vld [vmem:[%s3374_s14 + $0x70] ss:$8 sps:$4 sm:$0xff]  }
  0x65   : > { %3064 = vmatprep.subr.bf16.mxu0 %v3263_v10  ;;  %v2505_v6 = vcombine.low %v712_v2, %v726_v3  ;;  %v3292_v3 = vld [vmem:[%s3704_s1 + $0x218] sm:$0xff]  }
  0x66   : > { %2961 = vmatmul.mubr.bf16.vlgmr.msra.gmra.mrb[0].mxu1 %v2503_v13  ;;  %v3280_v13 = vld [vmem:[%s3704_s1 + $0x1f8] sm:$0xff]  }
  0x67   : > { %2969 = vmatpush3.bf16.msra.mxu1 %v3261_v7  ;;  %3057 = vmatmul.mubr.bf16.vlgmr.msra.gmra.mrb[0].mxu0 %v3264_v11  ;;  %v3281_v7 = vld [vmem:[%s3374_s14 + $0x90] ss:$8 sps:$4 sm:$0xff]  }
  0x68   : > { %3065 = vmatpush3.bf16.msra.mxu0 %v3263_v10  ;;  %2970 = vmatprep.subr.bf16.mxu1 %v3265_v14  ;;  %v3276_v10 = vld [vmem:[%s3704_s1 + $0xf0] sm:$0xff]  }
  0x69   : > { %3066 = vmatprep.subr.bf16.mxu0 %v3266_v18  ;;  %3060 = vmatprep.mubr.bf16.mxu0 %v3275_v25  ;;  %v3278_v11 = vld [vmem:[%s3704_s1 + $0x1f0] sm:$0xff]   ;;  %v2710_v25 = vld [vmem:[%s3374_s14 + $0x28] sm:$0xf] }
  0x6a   : > { %2964 = vmatprep.mubr.bf16.mxu1 %v2504_v62  ;;  %v2016_v36 = vshrl.u32 %v2710_v25, 16  ;;  %v2019_v37 = vshll.u32 %v2710_v25, 16 }
  0x6b   : > { %2971 = vmatpush3.bf16.msra.mxu1 %v3265_v14  ;;  %v3285_v14 = vld [vmem:[%s3704_s1 + $0x200] sm:$0xff]  }
  0x6c   : > { %3067 = vmatpush3.bf16.msra.mxu0 %v3266_v18  ;;  %2972 = vmatprep.subr.bf16.mxu1 %v3267_v35  ;;  %v2705_v18 = vld [vmem:[%s3374_s14 + $0x14] sm:$0x1]  ;;  %v2018_v47 = vrot.slane %v2016_v36, 4  ;;  %v2021_v48 = vrot.slane %v2019_v37, 5 }
  0x6d   : > { %3068 = vmatprep.subr.bf16.mxu0 %v3268_v41  ;;  %v1983_v24 = vshll.u32 %v2705_v18, 16  ;;  %v3295_v37 = vld [vmem:[%s3704_s1 + $0x230] sm:$0xff]  }
  0x6e   : > { %2965 = vmatmul.mubr.bf16.gmra.mrb[4].mxu1 %v2505_v6  ;;  %v2022_v55 = vor.u32 %v2021_v48, %v2018_v47  ;;  %v2716_v6 = vld [vmem:[%s3374_s14 + $0x40] sm:$0xf] }
  0x6f   : > { %2973 = vmatpush3.bf16.msra.mxu1 %v3267_v35  ;;  %3061 = vmatmul.mubr.bf16.gmra.mrb[4].mxu0 %v3277_v58  ;;  %v1966_v35 = vor.u32 %v1965_v27, %v1962_v26  ;;  %v1985_v46 = vrot.slane %v1983_v24, 5 }
  0x70   : > { %3069 = vmatpush3.bf16.msra.mxu0 %v3268_v41  ;;  %2974 = vmatprep.subr.bf16.mxu1 %v3269_v50  ;;  %v2030_v41 = vshrl.u32 %v2712_v29, 16  ;;  %v2023_v60 = vrot.slane %v2022_v55, 4 }
  0x71   : > { %3070 = vmatprep.subr.bf16.mxu0 %v3270_v61  ;;  %3080 = vmatprep.mubr.bf16.mxu0 %v3282_v4  ;;  %v1986_v63 = vsel %vm3445_vm2, %v1981_v51, %v1985_v46  ;;  %v3296_v46 = vld [vmem:[%s3704_s1 + $0x238] sm:$0xff]  }
  0x72   : > { %2984 = vmatprep.mubr.bf16.mxu1 %v3281_v7  ;;  %v2032_v52 = vrot.slane %v2030_v41, 4  ;;  %v2028_v2 = vsel %vm3445_vm2, %v2023_v60, %v2027_v56  ;;  %v2011_v41 = vshll.u32 %v2709_v32, 16 }
  0x73   : > { %2975 = vmatpush3.bf16.msra.mxu1 %v3269_v50  ;;  %v1967_v50 = vrot.slane %v1966_v35, 4 }
  0x74   : > { %3071 = vmatpush3.bf16.msra.mxu0 %v3270_v61  ;;  %2976 = vmatprep.subr.bf16.mxu1 %v3271_v1  ;;  %v2036_v58 = vor.u32 %v2035_v54, %v2032_v52  ;;  %v3289_v61 = vld [vmem:[%s3374_s14 + $0xc0] ss:$8 sps:$4 sm:$0xff]  }
  0x75   : > { %3072 = vmatprep.subr.bf16.mxu0 %v3272_v5  ;;  %v1972_v62 = vsel %vm3445_vm2, %v1967_v50, %v1971_v45  ;;  %v2013_v50 = vrot.slane %v2011_v41, 5 }
  0x76   : > { %v2037_v0 = vrot.slane %v2036_v58, 4  ;;  %v2734_v7 = vcombine.low %v1972_v62, %v1986_v63 }
  0x77   : > { %2977 = vmatpush3.bf16.msra.mxu1 %v3271_v1  ;;  %v3290_v1 = vld [vmem:[%s3374_s14 + $0x80] ss:$8 sps:$4 sm:$0xff]  }
  0x78   : > { %3073 = vmatpush3.bf16.msra.mxu0 %v3272_v5  ;;  %2978 = vmatprep.subr.bf16.mxu1 %v3273_v8  ;;  %v2042_v4 = vsel %vm3445_vm2, %v2037_v0, %v2041_v59  ;;  %v2714_v5 = vld [vmem:[%s3374_s14 + $0x38] sm:$0xf] }
  0x79   : > { %3074 = vmatprep.subr.bf16.mxu0 %v3274_v9 }
  0x7b   : > { %2979 = vmatpush3.bf16.msra.mxu1 %v3273_v8  ;;  %v2706_v8 = vld [vmem:[%s3374_s14 + $0x18] sm:$0xf] }
  0x7c   : > { %3075 = vmatpush3.bf16.msra.mxu0 %v3274_v9  ;;  %2980 = vmatprep.subr.bf16.mxu1 %v3276_v10  ;;  %v2708_v9 = vld [vmem:[%s3374_s14 + $0x20] sm:$0xf]  ;;  %v1988_v16 = vshrl.u32 %v2706_v8, 16  ;;  %v1991_v17 = vshll.u32 %v2706_v8, 16 }
  0x7d   : > { %3076 = vmatprep.subr.bf16.mxu0 %v3278_v11  ;;  %v2002_v18 = vshrl.u32 %v2708_v9, 16  ;;  %v2005_v19 = vshll.u32 %v2708_v9, 16 }
  0x7e   : > { %v1990_v26 = vrot.slane %v1988_v16, 4  ;;  %v1993_v27 = vrot.slane %v1991_v17, 5 }
  0x7f   : > { %2981 = vmatpush3.bf16.msra.mxu1 %v3276_v10  ;;  %v2736_v10 = vcombine.low %v2028_v2, %v2042_v4  ;;  %v2004_v28 = vrot.slane %v2002_v18, 4  ;;  %v2007_v29 = vrot.slane %v2005_v19, 5 }
  0x80   : > { %3077 = vmatpush3.bf16.msra.mxu0 %v3278_v11  ;;  %2982 = vmatprep.subr.bf16.mxu1 %v3279_v12  ;;  %v2044_v11 = vshrl.u32 %v2714_v5, 16  ;;  %v1994_v38 = vor.u32 %v1993_v27, %v1990_v26 }
  0x81   : > { %3078 = vmatprep.subr.bf16.mxu0 %v3280_v13  ;;  %v2008_v40 = vor.u32 %v2007_v29, %v2004_v28 }
  0x82   : > { %v2046_v22 = vrot.slane %v2044_v11, 4  ;;  %v1995_v47 = vrot.slane %v1994_v38, 4 }
  0x83   : > { %2983 = vmatpush3.bf16.msra.mxu1 %v3279_v12  ;;  %v2047_v12 = vshll.u32 %v2714_v5, 16 }
  0x84   : > { %3079 = vmatpush3.bf16.msra.mxu0 %v3280_v13  ;;  %3112 = vmatprep.subr.bf16.mxu1 %v3285_v14  ;;  %v2058_v13 = vshrl.u32 %v2716_v6, 16 }
  0x85   : > { %3088 = vmatprep.subr.bf16.mxu0 %v3285_v14  ;;  %v2049_v23 = vrot.slane %v2047_v12, 5 }
  0x86   : > { %2985 = vmatmul.mubr.bf16.vlgmr.msra.gmra.mrb[0].mxu1 %v3283_v30  ;;  %v2060_v24 = vrot.slane %v2058_v13, 4  ;;  %v2717_v30 = vld [vmem:[%s3374_s14 + $0x44] sm:$0x1] }
  0x87   : > { %3081 = vmatmul.mubr.bf16.vlgmr.msra.gmra.mrb[0].mxu0 %v3284_v34  ;;  %3120 = vmatpush3.bf16.msra.mxu1 %v3285_v14  ;;  %v2050_v33 = vor.u32 %v2049_v23, %v2046_v22  ;;  %v2053_v34 = vshll.u32 %v2715_v21, 16  ;;  %v2067_v36 = vshll.u32 %v2717_v30, 16 }
  0x88   : > { %3089 = vmatpush3.bf16.msra.mxu0 %v3285_v14  ;;  %3113 = vmatprep.subr.bf16.mxu1 %v3286_v39  ;;  %v2061_v14 = vshll.u32 %v2716_v6, 16 }
  0x89   : > { %3090 = vmatprep.subr.bf16.mxu0 %v3286_v39  ;;  %2988 = vmatprep.mubr.bf16.mxu1 %v3287_v44  ;;  %v2051_v42 = vrot.slane %v2050_v33, 4  ;;  %v2055_v43 = vrot.slane %v2053_v34, 5  ;;  %v2069_v45 = vrot.slane %v2067_v36, 5 }
  0x8a   : > { %3084 = vmatprep.mubr.bf16.mxu0 %v3288_v49  ;;  %v2063_v25 = vrot.slane %v2061_v14, 5  ;;  %v2009_v49 = vrot.slane %v2008_v40, 4 }
  0x8b   : > { %3121 = vmatpush3.bf16.msra.mxu1 %v3286_v39  ;;  %v2056_v51 = vsel %vm3445_vm2, %v2051_v42, %v2055_v43 }
  0x8c   : > { %3091 = vmatpush3.bf16.msra.mxu0 %v3286_v39  ;;  %3114 = vmatprep.subr.bf16.mxu1 %v3291_v57  ;;  %v2064_v35 = vor.u32 %v2063_v25, %v2060_v24  ;;  %v1997_v39 = vshll.u32 %v2707_v31, 16  ;;  %v2014_v55 = vsel %vm3445_vm2, %v2009_v49, %v2013_v50 }
  0x8d   : > { %3092 = vmatprep.subr.bf16.mxu0 %v3291_v57 }
  0x8e   : > { %2989 = vmatmul.mubr.bf16.gmra.mrb[4].mxu1 %v3289_v61  ;;  %v2065_v44 = vrot.slane %v2064_v35, 4  ;;  %v1999_v48 = vrot.slane %v1997_v39, 5 }
  0x8f   : > { %3085 = vmatmul.mubr.bf16.gmra.mrb[4].mxu0 %v3290_v1  ;;  %3122 = vmatpush3.bf16.msra.mxu1 %v3291_v57 }
  0x90   : > { %3093 = vmatpush3.bf16.msra.mxu0 %v3291_v57  ;;  %3115 = vmatprep.subr.bf16.mxu1 %v3292_v3  ;;  %v2070_v52 = vsel %vm3445_vm2, %v2065_v44, %v2069_v45  ;;  %v2000_v54 = vsel %vm3445_vm2, %v1995_v47, %v1999_v48 }
  0x91   : > { %3094 = vmatprep.subr.bf16.mxu0 %v3292_v3  ;;  %3104 = vmatprep.mubr.bf16.mxu0 %v2734_v7  ;;  %v2737_v56 = vcombine.low %v2056_v51, %v2070_v52  ;;  %v2735_v57 = vcombine.low %v2000_v54, %v2014_v55 }
  0x92   : > { %3108 = vmatprep.mubr.bf16.mxu1 %v2736_v10 }
  0x93   : > { %3123 = vmatpush3.bf16.msra.mxu1 %v3292_v3 }
  0x94   : > { %3095 = vmatpush3.bf16.msra.mxu0 %v3292_v3  ;;  %3116 = vmatprep.subr.bf16.mxu1 %v3293_v15 }
  0x95   : > { %3096 = vmatprep.subr.bf16.mxu0 %v3293_v15 }
  0x97   : > { %3124 = vmatpush3.bf16.msra.mxu1 %v3293_v15 }
  0x98   : > { %3097 = vmatpush3.bf16.msra.mxu0 %v3293_v15  ;;  %3117 = vmatprep.subr.bf16.mxu1 %v3294_v20 }
  0x99   : > { %3098 = vmatprep.subr.bf16.mxu0 %v3294_v20 }
  0x9b   : > { %3125 = vmatpush3.bf16.msra.mxu1 %v3294_v20 }
  0x9c   : > { %3099 = vmatpush3.bf16.msra.mxu0 %v3294_v20  ;;  %3118 = vmatprep.subr.bf16.mxu1 %v3295_v37 }
  0x9d   : > { %3100 = vmatprep.subr.bf16.mxu0 %v3295_v37 }
  0x9f   : > { %3126 = vmatpush3.bf16.msra.mxu1 %v3295_v37 }
  0xa0   : > { %3101 = vmatpush3.bf16.msra.mxu0 %v3295_v37  ;;  %3119 = vmatprep.subr.bf16.mxu1 %v3296_v46 }
  0xa1   : > { %3102 = vmatprep.subr.bf16.mxu0 %v3296_v46 }
  0xa3   : > { %3127 = vmatpush3.bf16.msra.mxu1 %v3296_v46 }
  0xa4   : > { %3103 = vmatpush3.bf16.msra.mxu0 %v3296_v46 }
  0xa6   : > { %3109 = vmatmul.mubr.bf16.vlgmr.msra.gmra.mrb[8].mxu1 %v2737_v56 }
  0xa7   : > { %3105 = vmatmul.mubr.bf16.vlgmr.msra.gmra.mrb[0].mxu0 %v2735_v57 }
 0x159   : > { %v2986_v58 = vpop.f32.mrb[0].mxu1 }
 0x15a   : > { %v1037_v59 = vpop.f32.mrb[1].mxu1 }
 0x15b   : > { %v2987_v60 = vpop.f32.mrb[2].mxu1 }
 0x15c   : > { %v1040_v61 = vpop.f32.mrb[3].mxu1 }
 0x161   : > { %v2990_v62 = vpop.f32.mrb[4].mxu1 }
 0x162   : > { %v3086_v63 = vpop.f32.mrb[4].mxu0  ;;  %v1053_v0 = vpop.f32.mrb[5].mxu1 }
 0x163   : > { %v3132_v1 = vadd.f32 %v3086_v63, %v2990_v62  ;;  %v1912_v2 = vpop.f32.mrb[5].mxu0  ;;  %v2991_v3 = vpop.f32.mrb[6].mxu1 }
 0x164   : > { %v3134_v53 = vadd.f32 %v1912_v2, %v1053_v0  ;;  %v3087_v4 = vpop.f32.mrb[6].mxu0  ;;  %v1056_v5 = vpop.f32.mrb[7].mxu1 }
 0x165   : > { %v3136_v6 = vadd.f32 %v3087_v4, %v2991_v3  ;;  %v1915_v7 = vpop.f32.mrb[7].mxu0 }
 0x166   : > { %v3138_v8 = vadd.f32 %v1915_v7, %v1056_v5 }
 0x179   : > { %v3110_v9 = vpop.f32.mrb[8].mxu1 }
 0x17a   : > { %v3106_v10 = vpop.f32.mrb[0].mxu0  ;;  %v3133_v11 = vadd.f32 %v3132_v1, %v3110_v9  ;;  %v2210_v12 = vpop.f32.mrb[9].mxu1 }
 0x17b   : > { %v3128_v13 = vadd.f32 %v3106_v10, %v2986_v58  ;;  %v2194_v14 = vpop.f32.mrb[1].mxu0  ;;  %v3135_v15 = vadd.f32 %v3134_v53, %v2210_v12  ;;  %v3111_v16 = vpop.f32.mrb[10].mxu1 }
 0x17c   : > { %v3129_v17 = vadd.f32 %v2194_v14, %v1037_v59  ;;  %v3107_v18 = vpop.f32.mrb[2].mxu0  ;;  %v3137_v19 = vadd.f32 %v3136_v6, %v3111_v16  ;;  %v2213_v20 = vpop.f32.mrb[11].mxu1  ;;  %v2309_v44 = vmul.f32 %v3133_v11, %v3133_v11 }
 0x17d   : > { %v3130_v21 = vadd.f32 %v3107_v18, %v2987_v60  ;;  %v2197_v22 = vpop.f32.mrb[3].mxu0  ;;  %v3139_v23 = vadd.f32 %v3138_v8, %v2213_v20  ;;  %v2305_v32 = vmul.f32 %v3128_v13, %v3128_v13  ;;  %v2307_v38 = vmul.f32 %v3135_v15, %v3135_v15 }
 0x17e   : > { %v2783_v24 = vpack.c.bf16 %v3137_v19, %v3133_v11  ;;  %v3131_v25 = vadd.f32 %v2197_v22, %v1040_v61  ;;  %v2303_v28 = vmul.f32 %v3129_v17, %v3129_v17  ;;  %v2310_v47 = vmul.f32 %v3137_v19, %v3137_v19 }
 0x17f   : > { %v2773_v26 = vpack.c.bf16 %v3130_v21, %v3128_v13  ;;  %v2778_v27 = vpack.c.bf16 %v3139_v23, %v3135_v15  ;;  %v2306_v35 = vmul.f32 %v3130_v21, %v3130_v21  ;;  %v2308_v42 = vmul.f32 %v3139_v23, %v3139_v23 }
 0x180   : > { %2787 = vst [vmem:[%s208_s28 + $0x18] sm:$0xff] %v2783_v24   ;;  %v2768_v29 = vpack.c.bf16 %v3131_v25, %v3129_v17  ;;  %v2289_v30 = vadd.f32 %v3131_v25, %v3129_v17  ;;  %v2304_v31 = vmul.f32 %v3131_v25, %v3131_v25 }
 0x181   : > { %2785 = vst [vmem:[%s208_s28 + $0x8] sm:$0xff] %v2773_v26   ;;  %2786 = vst [vmem:[%s208_s28 + $0x10] sm:$0xff] %v2778_v27  }
 0x182   : > { %2769 = vst [vmem:[%s208_s28] sm:$0xff] %v2768_v29   ;;  %v2290_v33 = vadd.f32 %v3128_v13, %v2289_v30  ;;  %v2311_v34 = vadd.f32 %v2304_v31, %v2303_v28 }
 0x184   : > { %v2312_v36 = vadd.f32 %v2311_v34, %v2305_v32  ;;  %v2291_v37 = vadd.f32 %v3130_v21, %v2290_v33 }
 0x186   : > { %v2292_v39 = vadd.f32 %v3135_v15, %v2291_v37  ;;  %v2313_v40 = vadd.f32 %v2312_v36, %v2306_v35 }
 0x188   : > { %v2293_v41 = vadd.f32 %v3139_v23, %v2292_v39  ;;  %v2314_v43 = vadd.f32 %v2313_v40, %v2307_v38 }
 0x18a   : > { %v2294_v45 = vadd.f32 %v3133_v11, %v2293_v41  ;;  %v2315_v46 = vadd.f32 %v2314_v43, %v2308_v42 }
 0x18c   : > { %v2295_v48 = vadd.f32 %v3137_v19, %v2294_v45  ;;  %v2316_v49 = vadd.f32 %v2315_v46, %v2309_v44 }
 0x18e   : > { %v2296_v50 = vrot.slane %v2295_v48, 4  ;;  %v2317_v51 = vadd.f32 %v2316_v49, %v2310_v47 }
 0x190   : > { %v2297_v52 = vadd.f32 %v2296_v50, %v2295_v48  ;;  %v2318_v54 = vrot.slane %v2317_v51, 4 }
 0x192   : > { %v2298_v55 = vrot.slane %v2297_v52, 2  ;;  %v2319_v56 = vadd.f32 %v2318_v54, %v2317_v51 }
 0x194   : > { %v2299_v57 = vadd.f32 %v2298_v55, %v2297_v52  ;;  %v2320_v58 = vrot.slane %v2319_v56, 2 }
 0x196   : > { %v2300_v59 = vrot.slane %v2299_v57, 1  ;;  %v2321_v60 = vadd.f32 %v2320_v58, %v2319_v56 }
 0x198   : > { %v2301_v61 = vadd.f32 %v2300_v59, %v2299_v57  ;;  %v2322_v62 = vrot.slane %v2321_v60, 1 }
 0x19a   : > { %2302 = vst [vmem:[%s211_s5] sm:$0x1] %v2301_v61  ;;  %v2323_v63 = vadd.f32 %v2322_v62, %v2321_v60 }
 0x19c   : > { %2324 = vst [vmem:[%s214_s8] sm:$0x1] %v2323_v63 }
 0x19d PF: > { %s15_s15 = sadd.s32 1, %s3303_s15  }
 0x19e   : > { %p12_p4 = scmp.ge.s32.totalorder %s15_s15, 4  }
 0x1a0   :  { %14 = sbr.rel (!%p12_p4) target bundleno = 1 (0x1), region = 95 }

// kernel: vae_forward.5
= control target key start
LH: loop header
LB: loop body
LE: loop exit
PB: predicated region body
PF: predicated region fallthrough
CT: control target
= control target key end

     0   :  { %v578_v0 = vmov 0.0   ;;  %vm579_vm0 = vmmov 0   ;;  %s751_s4 = inlined_call_operand.vmem [shape: bf16[128,128], index: 4, kind: input, shape index: {}]   ;;  %s752_s3 = inlined_call_operand.vmem [shape: bf16[256,128], index: 3, kind: input, shape index: {}]   ;;  %s753_s0 = inlined_call_operand.vmem [shape: bf16[8,256], index: 0, kind: input, shape index: {}]   ;;  %s754_s5 = inlined_call_operand.vmem [shape: bf16[128,128], index: 5, kind: input, shape index: {}]   ;;  %s755_s1 = inlined_call_operand.vmem [shape: bf16[8,128], index: 1, kind: input, shape index: {}]   ;;  %s756_s2 = inlined_call_operand.vmem [shape: bf16[8,128], index: 2, kind: input, shape index: {}]   ;;  %s757_s6 = inlined_call_operand.vmem [shape: f32[1,128], index: 6, kind: input, shape index: {}]   ;;  %s758_s7 = inlined_call_operand.vmem [shape: f32[8,128], index: 7, kind: output, shape index: {}]  }
   0x1   :  { %502 = vmatprep.subr.bf16.mxu0 %v578_v0  ;;  %v544_v1 = vld [vmem:[%s751_s4] sm:$0xff]   ;;  %518 = vmatprep.mubr.msk.bf16.mxu0 %vm579_vm0, %v578_v0  ;;  %v547_v4 = vld [vmem:[%s751_s4 + $0x8] sm:$0xff]   ;;  %v550_v7 = vld [vmem:[%s751_s4 + $0x10] sm:$0xff]  }
   0x2   :  { %v545_v2 = vld [vmem:[%s752_s3 + $0x40] sm:$0xff]   ;;  %503 = vmatpush3.bf16.msra.mxu0 %v544_v1  ;;  %v548_v5 = vld [vmem:[%s752_s3 + $0x48] sm:$0xff]   ;;  %v551_v8 = vld [vmem:[%s752_s3 + $0x50] sm:$0xff]  }
   0x3   :  { %v546_v3 = vld [vmem:[%s752_s3] sm:$0xff]   ;;  %471 = vmatprep.subr.bf16.mxu1 %v545_v2  ;;  %504 = vmatprep.subr.bf16.mxu0 %v578_v0  ;;  %v549_v6 = vld [vmem:[%s752_s3 + $0x8] sm:$0xff]   ;;  %v552_v9 = vld [vmem:[%s752_s3 + $0x10] sm:$0xff]  }
   0x4   :  { %472 = vmatpush3.bf16.msra.mxu1 %v546_v3  ;;  %v553_v10 = vld [vmem:[%s751_s4 + $0x18] sm:$0xff]   ;;  %v557_v13 = vld [vmem:[%s752_s3 + $0x60] sm:$0xff]   ;;  %v560_v16 = vld [vmem:[%s752_s3 + $0x68] sm:$0xff]  }
   0x5   :  { %473 = vmatprep.subr.bf16.mxu1 %v548_v5  ;;  %v554_v11 = vld [vmem:[%s752_s3 + $0x58] sm:$0xff]   ;;  %v556_v14 = vld [vmem:[%s751_s4 + $0x20] sm:$0xff]   ;;  %v559_v17 = vld [vmem:[%s751_s4 + $0x28] sm:$0xff]  }
   0x6   :  { %505 = vmatpush3.bf16.msra.mxu0 %v547_v4  ;;  %v555_v12 = vld [vmem:[%s752_s3 + $0x18] sm:$0xff]   ;;  %v558_v15 = vld [vmem:[%s752_s3 + $0x20] sm:$0xff]   ;;  %v561_v18 = vld [vmem:[%s752_s3 + $0x28] sm:$0xff]  }
   0x7   :  { %506 = vmatprep.subr.bf16.mxu0 %v578_v0  ;;  %v563_v19 = vld [vmem:[%s752_s3 + $0x70] sm:$0xff]   ;;  %v27_v22 = vld [vmem:[%s753_s0] sm:$0xff]  ;;  %v566_v23 = vld [vmem:[%s752_s3 + $0x78] sm:$0xff]  }
   0x8   :  { %474 = vmatpush3.bf16.msra.mxu1 %v549_v6  ;;  %v562_v20 = vld [vmem:[%s751_s4 + $0x30] sm:$0xff]   ;;  %v436_v24 = vcombine.high %v27_v22, %v27_v22  ;;  %v565_v25 = vld [vmem:[%s751_s4 + $0x38] sm:$0xff]   ;;  %v60_v27 = vld [vmem:[%s755_s1] sm:$0xf]  ;;  %v435_v29 = vcombine.low %v27_v22, %v27_v22 }
   0x9   :  { %475 = vmatprep.subr.bf16.mxu1 %v551_v8  ;;  %v564_v21 = vld [vmem:[%s752_s3 + $0x30] sm:$0xff]   ;;  %v567_v26 = vld [vmem:[%s752_s3 + $0x38] sm:$0xff]   ;;  %v570_v28 = vld [vmem:[%s754_s5] sm:$0xff]  }
   0xa   :  { %507 = vmatpush3.bf16.msra.mxu0 %v550_v7  ;;  %300 = vmatprep.mubr.bf16.mxu1 %v436_v24  ;;  %v571_v30 = vld [vmem:[%s754_s5 + $0x8] sm:$0xff]   ;;  %v572_v31 = vld [vmem:[%s754_s5 + $0x10] sm:$0xff]   ;;  %v573_v32 = vld [vmem:[%s754_s5 + $0x18] sm:$0xff]  }
   0xb   :  { %508 = vmatprep.subr.bf16.mxu0 %v578_v0  ;;  %v574_v33 = vld [vmem:[%s754_s5 + $0x20] sm:$0xff]   ;;  %v575_v34 = vld [vmem:[%s754_s5 + $0x28] sm:$0xff]   ;;  %v576_v35 = vld [vmem:[%s754_s5 + $0x30] sm:$0xff]  }
   0xc   :  { %476 = vmatpush3.bf16.msra.mxu1 %v552_v9  ;;  %v577_v36 = vld [vmem:[%s754_s5 + $0x38] sm:$0xff]   ;;  %v308_v37 = vld [vmem:[%s756_s2] sm:$0xf] }
   0xd   :  { %477 = vmatprep.subr.bf16.mxu1 %v554_v11  ;;  %v461_v49 = vld [vmem:[%s757_s6] ss:$0 sm:$0xff] }
   0xe   :  { %509 = vmatpush3.bf16.msra.mxu0 %v553_v10 }
   0xf   :  { %510 = vmatprep.subr.bf16.mxu0 %v578_v0 }
  0x10   :  { %478 = vmatpush3.bf16.msra.mxu1 %v555_v12 }
  0x11   :  { %479 = vmatprep.subr.bf16.mxu1 %v557_v13 }
  0x12   :  { %511 = vmatpush3.bf16.msra.mxu0 %v556_v14 }
  0x13   :  { %512 = vmatprep.subr.bf16.mxu0 %v578_v0 }
  0x14   :  { %480 = vmatpush3.bf16.msra.mxu1 %v558_v15 }
  0x15   :  { %481 = vmatprep.subr.bf16.mxu1 %v560_v16 }
  0x16   :  { %513 = vmatpush3.bf16.msra.mxu0 %v559_v17 }
  0x17   :  { %514 = vmatprep.subr.bf16.mxu0 %v578_v0 }
  0x18   :  { %482 = vmatpush3.bf16.msra.mxu1 %v561_v18 }
  0x19   :  { %483 = vmatprep.subr.bf16.mxu1 %v563_v19 }
  0x1a   :  { %515 = vmatpush3.bf16.msra.mxu0 %v562_v20 }
  0x1b   :  { %516 = vmatprep.subr.bf16.mxu0 %v578_v0 }
  0x1c   :  { %484 = vmatpush3.bf16.msra.mxu1 %v564_v21 }
  0x1d   :  { %485 = vmatprep.subr.bf16.mxu1 %v566_v23 }
  0x1e   :  { %517 = vmatpush3.bf16.msra.mxu0 %v565_v25 }
  0x1f   :  { %522 = vmatprep.subr.bf16.mxu0 %v578_v0 }
  0x20   :  { %486 = vmatpush3.bf16.msra.mxu1 %v567_v26 }
  0x21   :  { %519 = vmatmul.mubr.bf16.vlgmr.msra.gmra.mrb[0].mxu0 %v60_v27 }
  0x22   :  { %523 = vmatpush3.bf16.msra.mxu0 %v570_v28  ;;  %538 = vmatprep.mubr.msk.bf16.mxu0 %vm579_vm0, %v578_v0 }
  0x23   :  { %301 = vmatmul.mubr.bf16.vlgmr.msra.gmra.mrb[0].mxu1 %v435_v29  ;;  %524 = vmatprep.subr.bf16.mxu0 %v578_v0 }
  0x26   :  { %525 = vmatpush3.bf16.msra.mxu0 %v571_v30 }
  0x27   :  { %526 = vmatprep.subr.bf16.mxu0 %v578_v0 }
  0x2a   :  { %527 = vmatpush3.bf16.msra.mxu0 %v572_v31 }
  0x2b   :  { %528 = vmatprep.subr.bf16.mxu0 %v578_v0 }
  0x2e   :  { %529 = vmatpush3.bf16.msra.mxu0 %v573_v32 }
  0x2f   :  { %530 = vmatprep.subr.bf16.mxu0 %v578_v0 }
  0x32   :  { %531 = vmatpush3.bf16.msra.mxu0 %v574_v33 }
  0x33   :  { %532 = vmatprep.subr.bf16.mxu0 %v578_v0 }
  0x36   :  { %533 = vmatpush3.bf16.msra.mxu0 %v575_v34 }
  0x37   :  { %534 = vmatprep.subr.bf16.mxu0 %v578_v0 }
  0x3a   :  { %535 = vmatpush3.bf16.msra.mxu0 %v576_v35 }
  0x3b   :  { %536 = vmatprep.subr.bf16.mxu0 %v578_v0 }
  0x3e   :  { %537 = vmatpush3.bf16.msra.mxu0 %v577_v36 }
  0x41   :  { %539 = vmatmul.mubr.bf16.vlgmr.msra.gmra.mrb[4].mxu0 %v308_v37 }
  0xf4   :  { %v159_v38 = vpop.f32.mrb[0].mxu0 }
  0xf5   :  { %v520_v39 = vpop.f32.mrb[1].mxu0 }
  0xf6   :  { %v487_v40 = vpop.f32.mrb[0].mxu1  ;;  %v162_v41 = vpop.f32.mrb[2].mxu0 }
  0xf7   :  { %v488_v42 = vpop.f32.mrb[1].mxu1  ;;  %v521_v43 = vpop.f32.mrb[3].mxu0 }
  0xf8   :  { %v489_v44 = vadd.f32 %v488_v42, %v487_v40  ;;  %v490_v45 = vpop.f32.mrb[2].mxu1 }
  0xf9   :  { %v491_v46 = vpop.f32.mrb[3].mxu1 }
  0xfa   :  { %v303_v47 = vadd.f32 %v489_v44, %v159_v38 }
 0x114   :  { %v407_v48 = vpop.f32.mrb[4].mxu0 }
 0x115   :  { %v413_v50 = vadd.f32 %v407_v48, %v303_v47  ;;  %v540_v51 = vpop.f32.mrb[5].mxu0 }
 0x116   :  { %v410_v52 = vpop.f32.mrb[6].mxu0 }
 0x117   :  { %v421_v53 = vadd.f32 %v461_v49, %v413_v50  ;;  %v541_v54 = vpop.f32.mrb[7].mxu0 }
 0x119   :  { %422 = vst [vmem:[%s758_s7] sm:$0xff] %v421_v53 }

// kernel: vae_forward.4
= control target key start
LH: loop header
LB: loop body
LE: loop exit
PB: predicated region body
PF: predicated region fallthrough
CT: control target
= control target key end

     0   :  { %s2607_s15 = smov 0   ;;  %s2920_s0 = inlined_call_operand.vmem [shape: bf16[2,20,9,128], index: 0, kind: input, shape index: {}]   ;;  %s2921_s1 = inlined_call_operand.vmem [shape: bf16[9,128,128], index: 1, kind: input, shape index: {}]   ;;  %s2922_s2 = inlined_call_operand.vmem [shape: bf16[2,32,128], index: 2, kind: output, shape index: {0}]   ;;  %s2923_s3 = inlined_call_operand.vmem [shape: f32[2,1,128], index: 3, kind: output, shape index: {1}]   ;;  %s2924_s4 = inlined_call_operand.vmem [shape: f32[2,1,128], index: 4, kind: output, shape index: {2}]  }
   0x1 LB: > { %s1895_s16 = sadd.s32 4294967295, %s2580_s15   ;;  %p1899_p0 = scmp.ge.s32.totalorder %s2580_s15, 1  ;;  %s2580_s15 = sphi %s2607_s15, %s15_s15  }
   0x2   : > { %p167_p1 = scmp.lt.s32.totalorder %s2580_s15, 3 }
   0x4   : > { %p168_p2 = pnand %p1899_p0, %p167_p1 }
   0x5   : > { %v2490_v0 = vld [vmem:[%s2921_s1] sm:$0xff] (!%p168_p2)   ;;  %p199_p3 = scmp.lt.s32.totalorder (!%p168_p2), %s1895_s16, 1  ;;  %v2492_v2 = vld [vmem:[%s2921_s1 + $0x8] sm:$0xff] (!%p168_p2)   ;;  %v2494_v4 = vld [vmem:[%s2921_s1 + $0x10] sm:$0xff] (!%p168_p2)   ;;  %vm512_vm0 = vsmask.f32 (!%p168_p2), 3328 }
   0x6   : > { %171 = sbr.rel (%p168_p2) target bundleno = 406 (0x196), region = 28  ;;  %v2491_v1 = vld [vmem:[%s2921_s1 + $0x100] sm:$0xff] (!%p168_p2)   ;;  %2269 = vmatprep.subr.bf16.mxu1 (!%p168_p2), %v2490_v0  ;;  %v2493_v3 = vld [vmem:[%s2921_s1 + $0x108] sm:$0xff] (!%p168_p2)   ;;  %v2495_v5 = vld [vmem:[%s2921_s1 + $0x110] sm:$0xff] (!%p168_p2)   ;;  %vm513_vm1 = vsmask.f32 (!%p168_p2), 7440 }
   0x7   : > { %2349 = vmatprep.subr.bf16.mxu0 (!%p168_p2), %v2491_v1  ;;  %2270 = vmatpush3.bf16.msra.mxu1 (!%p168_p2), %v2490_v0  ;;  %v2496_v6 = vld [vmem:[%s2921_s1 + $0x18] sm:$0xff] (!%p168_p2)   ;;  %v2498_v8 = vld [vmem:[%s2921_s1 + $0x20] sm:$0xff] (!%p168_p2)   ;;  %v2500_v10 = vld [vmem:[%s2921_s1 + $0x28] sm:$0xff] (!%p168_p2)  }
   0x8   : > { %2350 = vmatpush3.bf16.msra.mxu0 (!%p168_p2), %v2491_v1  ;;  %2271 = vmatprep.subr.bf16.mxu1 (!%p168_p2), %v2492_v2  ;;  %v2497_v7 = vld [vmem:[%s2921_s1 + $0x118] sm:$0xff] (!%p168_p2)   ;;  %v2499_v9 = vld [vmem:[%s2921_s1 + $0x120] sm:$0xff] (!%p168_p2)   ;;  %v2501_v12 = vld [vmem:[%s2921_s1 + $0x128] sm:$0xff] (!%p168_p2)  }
   0x9   : > { %2351 = vmatprep.subr.bf16.mxu0 (!%p168_p2), %v2493_v3  ;;  %v2502_v14 = vld [vmem:[%s2921_s1 + $0x30] sm:$0xff] (!%p168_p2)   ;;  %v2504_v16 = vld [vmem:[%s2921_s1 + $0x38] sm:$0xff] (!%p168_p2)   ;;  %v2507_v18 = vld [vmem:[%s2921_s1 + $0x40] sm:$0xff] (!%p168_p2)  }
   0xa   : > { %v2503_v15 = vld [vmem:[%s2921_s1 + $0x130] sm:$0xff] (!%p168_p2)   ;;  %v2505_v17 = vld [vmem:[%s2921_s1 + $0x138] sm:$0xff] (!%p168_p2)   ;;  %v2509_v19 = vld [vmem:[%s2921_s1 + $0x140] sm:$0xff] (!%p168_p2)  }
   0xb   : > { %2272 = vmatpush3.bf16.msra.mxu1 (!%p168_p2), %v2492_v2  ;;  %v2512_v22 = vld [vmem:[%s2921_s1 + $0x48] sm:$0xff] (!%p168_p2)   ;;  %v2514_v24 = vld [vmem:[%s2921_s1 + $0x50] sm:$0xff] (!%p168_p2)   ;;  %v2516_v32 = vld [vmem:[%s2921_s1 + $0x58] sm:$0xff] (!%p168_p2)  }
   0xc   : > { %2352 = vmatpush3.bf16.msra.mxu0 (!%p168_p2), %v2493_v3  ;;  %2273 = vmatprep.subr.bf16.mxu1 (!%p168_p2), %v2494_v4  ;;  %v2513_v23 = vld [vmem:[%s2921_s1 + $0x148] sm:$0xff] (!%p168_p2)   ;;  %v2515_v26 = vld [vmem:[%s2921_s1 + $0x150] sm:$0xff] (!%p168_p2)   ;;  %v2517_v37 = vld [vmem:[%s2921_s1 + $0x158] sm:$0xff] (!%p168_p2)  }
   0xd   : > { %s2928_s16 = smov (!%p199_p3, %s1895_s16), 1  ;;  %2353 = vmatprep.subr.bf16.mxu0 %v2495_v5  ;;  %v2518_v41 = vld [vmem:[%s2921_s1 + $0x60] sm:$0xff]   ;;  %vm2712_vm2 = vmor %vm512_vm0, %vm513_vm1  ;;  %v2520_v59 = vld [vmem:[%s2921_s1 + $0x68] sm:$0xff]  }
   0xe   : > { %s2481_s7 = smul.u32 160, %s2928_s16  ;;  %v2519_v44 = vld [vmem:[%s2921_s1 + $0x160] sm:$0xff]   ;;  %v2521_v63 = vld [vmem:[%s2921_s1 + $0x168] sm:$0xff]   ;;  %s211_s5 = scalar_lea.vmem %s2923_s3, %s2928_s16 }
   0xf   : > { %2274 = vmatpush3.bf16.msra.mxu1 %v2494_v4  ;;  %s214_s8 = scalar_lea.vmem %s2924_s4, %s2928_s16 }
  0x10   : > { %2354 = vmatpush3.bf16.msra.mxu0 %v2495_v5  ;;  %2275 = vmatprep.subr.bf16.mxu1 %v2496_v6  ;;  %s2651_s14 = scalar_lea.vmem %s2920_s0, %s2481_s7 }
  0x11   : > { %2355 = vmatprep.subr.bf16.mxu0 %v2497_v7  ;;  %v2506_v11 = vld [vmem:[%s2651_s14] ss:$8 sps:$4 sm:$0xff]   ;;  %v2510_v20 = vld [vmem:[%s2651_s14 + $0x10] ss:$8 sps:$4 sm:$0xff]   ;;  %v2030_v28 = vld [vmem:[%s2651_s14 + $0x54] sm:$0x1] }
  0x12   : > { %2285 = vmatprep.mubr.bf16.mxu1 %v2506_v11  ;;  %v2508_v13 = vld [vmem:[%s2651_s14 + $0x78] ss:$8 sps:$4 sm:$0xff]   ;;  %v2511_v21 = vld [vmem:[%s2651_s14 + $0x88] ss:$8 sps:$4 sm:$0xff]   ;;  %v2032_v33 = vld [vmem:[%s2651_s14 + $0x5c] sm:$0x1] }
  0x13   : > { %2276 = vmatpush3.bf16.msra.mxu1 %v2496_v6  ;;  %2365 = vmatprep.mubr.bf16.mxu0 %v2508_v13  ;;  %v2526_v25 = vld [vmem:[%s2651_s14 + $0x28] ss:$8 sps:$4 sm:$0xff]   ;;  %v2031_v29 = vld [vmem:[%s2651_s14 + $0x58] sm:$0xf]  ;;  %v1009_v34 = vshll.u32 %v2030_v28, 16  ;;  %v1023_v40 = vshll.u32 %v2032_v33, 16 }
  0x14   : > { %2356 = vmatpush3.bf16.msra.mxu0 %v2497_v7  ;;  %2277 = vmatprep.subr.bf16.mxu1 %v2498_v8  ;;  %v2029_v27 = vld [vmem:[%s2651_s14 + $0x50] sm:$0xf]  ;;  %v1014_v35 = vshrl.u32 %v2031_v29, 16  ;;  %v1017_v36 = vshll.u32 %v2031_v29, 16  ;;  %v2033_v50 = vld [vmem:[%s2651_s14 + $0x60] sm:$0xf] }
  0x15   : > { %2357 = vmatprep.subr.bf16.mxu0 %v2499_v9  ;;  %v1000_v30 = vshrl.u32 %v2029_v27, 16  ;;  %v1003_v31 = vshll.u32 %v2029_v27, 16  ;;  %v1011_v46 = vrot.slane %v1009_v34, 5  ;;  %v1025_v49 = vrot.slane %v1023_v40, 5  ;;  %v2034_v51 = vld [vmem:[%s2651_s14 + $0x64] sm:$0x1] }
  0x16   : > { %v1016_v42 = vrot.slane %v1014_v35, 4  ;;  %v1019_v43 = vrot.slane %v1017_v36, 5  ;;  %v2035_v53 = vld [vmem:[%s2651_s14 + $0x68] sm:$0xf]  ;;  %v2036_v54 = vld [vmem:[%s2651_s14 + $0x6c] sm:$0x1] }
  0x17   : > { %2278 = vmatpush3.bf16.msra.mxu1 %v2498_v8  ;;  %v1002_v38 = vrot.slane %v1000_v30, 4  ;;  %v1005_v39 = vrot.slane %v1003_v31, 5  ;;  %v1028_v55 = vshrl.u32 %v2033_v50, 16  ;;  %v1031_v57 = vshll.u32 %v2033_v50, 16  ;;  %v2522_v7 = vld [vmem:[%s2921_s1 + $0x70] sm:$0xff]   ;;  %v2524_v11 = vld [vmem:[%s2921_s1 + $0x78] sm:$0xff]  }
  0x18   : > { %2358 = vmatpush3.bf16.msra.mxu0 %v2499_v9  ;;  %2279 = vmatprep.subr.bf16.mxu1 %v2500_v10  ;;  %v1020_v48 = vor.u32 %v1019_v43, %v1016_v42  ;;  %v1042_v58 = vshrl.u32 %v2035_v53, 16  ;;  %v1037_v61 = vshll.u32 %v2034_v51, 16  ;;  %v1045_v62 = vshll.u32 %v2035_v53, 16  ;;  %v2530_v33 = vld [vmem:[%s2921_s1 + $0x88] sm:$0xff]   ;;  %v510_v53 = vld [vmem:[%s2651_s14 + $0x18] sm:$0xf] }
  0x19   : > { %2359 = vmatprep.subr.bf16.mxu0 %v2501_v12  ;;  %v1006_v45 = vor.u32 %v1005_v39, %v1002_v38  ;;  %v1030_v1 = vrot.slane %v1028_v55, 4  ;;  %v1033_v2 = vrot.slane %v1031_v57, 5  ;;  %v1051_v6 = vshll.u32 %v2036_v54, 16  ;;  %v2545_v39 = vld [vmem:[%s2651_s14 + $0x8] ss:$8 sps:$4 sm:$0xff]   ;;  %v2535_v55 = vld [vmem:[%s2921_s1 + $0x198] sm:$0xff]  }
  0x1a   : > { %v1021_v56 = vrot.slane %v1020_v48, 4  ;;  %v1044_v3 = vrot.slane %v1042_v58, 4  ;;  %v1047_v5 = vrot.slane %v1045_v62, 5  ;;  %v509_v62 = vld [vmem:[%s2651_s14 + $0x14] sm:$0x1] }
  0x1b   : > { %2280 = vmatpush3.bf16.msra.mxu1 %v2500_v10  ;;  %v1007_v52 = vrot.slane %v1006_v45, 4  ;;  %v1034_v8 = vor.u32 %v1033_v2, %v1030_v1  ;;  %v2523_v10 = vld [vmem:[%s2921_s1 + $0x170] sm:$0xff]   ;;  %v1053_v13 = vrot.slane %v1051_v6, 5  ;;  %v553_v6 = vshll.u32 %v509_v62, 16 }
  0x1c   : > { %2360 = vmatpush3.bf16.msra.mxu0 %v2501_v12  ;;  %2281 = vmatprep.subr.bf16.mxu1 %v2502_v14  ;;  %v1026_v0 = vsel %vm2712_vm2, %v1021_v56, %v1025_v49  ;;  %v1048_v9 = vor.u32 %v1047_v5, %v1044_v3  ;;  %v1039_v12 = vrot.slane %v1037_v61, 5  ;;  %v2534_v49 = vld [vmem:[%s2921_s1 + $0x98] sm:$0xff]   ;;  %v2536_v56 = vld [vmem:[%s2921_s1 + $0xa0] sm:$0xff]   ;;  %v2539_v5 = vld [vmem:[%s2921_s1 + $0x1a8] sm:$0xff]  }
  0x1d   : > { %2361 = vmatprep.subr.bf16.mxu0 %v2503_v15  ;;  %v1012_v60 = vsel %vm2712_vm2, %v1007_v52, %v1011_v46  ;;  %v2533_v46 = vld [vmem:[%s2921_s1 + $0x190] sm:$0xff]   ;;  %v2537_v61 = vld [vmem:[%s2921_s1 + $0x1a0] sm:$0xff]  }
  0x1e   : > { %v2053_v4 = vcombine.low %v1012_v60, %v1026_v0  ;;  %v508_v52 = vld [vmem:[%s2651_s14 + $0x10] sm:$0xf]  ;;  %v561_v60 = vshll.u32 %v510_v53, 16 }
  0x1f   : > { %2282 = vmatpush3.bf16.msra.mxu1 %v2502_v14  ;;  %v1035_v14 = vrot.slane %v1034_v8, 4  ;;  %v544_v57 = vshrl.u32 %v508_v52, 16  ;;  %v547_v58 = vshll.u32 %v508_v52, 16 }
  0x20   : > { %2362 = vmatpush3.bf16.msra.mxu0 %v2503_v15  ;;  %2283 = vmatprep.subr.bf16.mxu1 %v2504_v16  ;;  %v1049_v15 = vrot.slane %v1048_v9, 4  ;;  %v563_v3 = vrot.slane %v561_v60, 5 }
  0x21   : > { %2363 = vmatprep.subr.bf16.mxu0 %v2505_v17  ;;  %v546_v0 = vrot.slane %v544_v57, 4  ;;  %v549_v1 = vrot.slane %v547_v58, 5 }
  0x23   : > { %2284 = vmatpush3.bf16.msra.mxu1 %v2504_v16  ;;  %v2525_v16 = vld [vmem:[%s2921_s1 + $0x178] sm:$0xff]   ;;  %v550_v8 = vor.u32 %v549_v1, %v546_v0  ;;  %v2563_v0 = vld [vmem:[%s2651_s14 + $0x60] ss:$8 sps:$4 sm:$0xff]  }
  0x24   : > { %2364 = vmatpush3.bf16.msra.mxu0 %v2505_v17  ;;  %2289 = vmatprep.subr.bf16.mxu1 %v2507_v18  ;;  %v2527_v17 = vld [vmem:[%s2921_s1 + $0x80] sm:$0xff]  }
  0x25   : > { %2369 = vmatprep.subr.bf16.mxu0 %v2509_v19  ;;  %v2566_v1 = vld [vmem:[%s2651_s14 + $0x40] ss:$8 sps:$4 sm:$0xff]  }
  0x26   : > { %2286 = vmatmul.mubr.bf16.vlgmr.msra.gmra.mrb[0].mxu1 %v2510_v20  ;;  %v1040_v20 = vsel %vm2712_vm2, %v1035_v14, %v1039_v12  ;;  %v555_v12 = vrot.slane %v553_v6, 5  ;;  %v551_v14 = vrot.slane %v550_v8, 4  ;;  %v2127_v6 = vld [vmem:[%s2651_s14 + $0x18] sm:$0xf] }
  0x27   : > { %2290 = vmatpush3.bf16.msra.mxu1 %v2507_v18  ;;  %2366 = vmatmul.mubr.bf16.vlgmr.msra.gmra.mrb[0].mxu0 %v2511_v21  ;;  %v2528_v18 = vld [vmem:[%s2921_s1 + $0x180] sm:$0xff]   ;;  %v1054_v21 = vsel %vm2712_vm2, %v1049_v15, %v1053_v13  ;;  %v1512_v8 = vshrl.u32 %v2127_v6, 16 }
  0x28   : > { %2370 = vmatpush3.bf16.msra.mxu0 %v2509_v19  ;;  %2291 = vmatprep.subr.bf16.mxu1 %v2512_v22  ;;  %v2529_v19 = vld [vmem:[%s2651_s14 + $0x38] ss:$8 sps:$4 sm:$0xff]   ;;  %v2054_v30 = vcombine.low %v1040_v20, %v1054_v21 }
  0x29   : > { %2371 = vmatprep.subr.bf16.mxu0 %v2513_v23  ;;  %2305 = vmatprep.mubr.bf16.mxu1 %v2526_v25  ;;  %v507_v25 = vld [vmem:[%s2651_s14 + $0xc] sm:$0x1]  ;;  %v2544_v20 = vld [vmem:[%s2921_s1 + $0xc0] sm:$0xff]  }
  0x2a   : > { %2385 = vmatprep.mubr.bf16.mxu0 %v2053_v4  ;;  %v2538_v4 = vld [vmem:[%s2921_s1 + $0xa8] sm:$0xff]   ;;  %v2546_v21 = vld [vmem:[%s2921_s1 + $0x1c0] sm:$0xff]  }
  0x2b   : > { %2292 = vmatpush3.bf16.msra.mxu1 %v2512_v22  ;;  %v504_v22 = vld [vmem:[%s2651_s14] sm:$0xf] }
  0x2c   : > { %2372 = vmatpush3.bf16.msra.mxu0 %v2513_v23  ;;  %2293 = vmatprep.subr.bf16.mxu1 %v2514_v24  ;;  %v505_v23 = vld [vmem:[%s2651_s14 + $0x4] sm:$0x1]  ;;  %v519_v27 = vshll.u32 %v504_v22, 16 }
  0x2d   : > { %2373 = vmatprep.subr.bf16.mxu0 %v2515_v26  ;;  %v525_v28 = vshll.u32 %v505_v23, 16  ;;  %v2547_v23 = vld [vmem:[%s2651_s14 + $0x18] ss:$8 sps:$4 sm:$0xff]  }
  0x2e   : > { %v521_v35 = vrot.slane %v519_v27, 5  ;;  %v2564_v27 = vld [vmem:[%s2651_s14 + $0x30] ss:$8 sps:$4 sm:$0xff]  }
  0x2f   : > { %2294 = vmatpush3.bf16.msra.mxu1 %v2514_v24  ;;  %v506_v24 = vld [vmem:[%s2651_s14 + $0x8] sm:$0xf] }
  0x30   : > { %2374 = vmatpush3.bf16.msra.mxu0 %v2515_v26  ;;  %2295 = vmatprep.subr.bf16.mxu1 %v2516_v32  ;;  %v516_v26 = vshrl.u32 %v504_v22, 16  ;;  %v530_v29 = vshrl.u32 %v506_v24, 16  ;;  %v533_v31 = vshll.u32 %v506_v24, 16  ;;  %v2548_v24 = vld [vmem:[%s2921_s1 + $0xc8] sm:$0xff]  }
  0x31   : > { %2375 = vmatprep.subr.bf16.mxu0 %v2517_v37 }
  0x32   : > { %v518_v34 = vrot.slane %v516_v26, 4  ;;  %v532_v36 = vrot.slane %v530_v29, 4  ;;  %v535_v38 = vrot.slane %v533_v31, 5  ;;  %v2562_v26 = vld [vmem:[%s2651_s14 + $0x50] ss:$8 sps:$4 sm:$0xff]  }
  0x33   : > { %2296 = vmatpush3.bf16.msra.mxu1 %v2516_v32  ;;  %v539_v32 = vshll.u32 %v507_v25, 16  ;;  %v2549_v25 = vld [vmem:[%s2921_s1 + $0x1c8] sm:$0xff]   ;;  %v2551_v29 = vld [vmem:[%s2921_s1 + $0x1d0] sm:$0xff]   ;;  %v2553_v31 = vld [vmem:[%s2921_s1 + $0x1d8] sm:$0xff]  }
  0x34   : > { %2376 = vmatpush3.bf16.msra.mxu0 %v2517_v37  ;;  %2297 = vmatprep.subr.bf16.mxu1 %v2518_v41  ;;  %v2531_v37 = vld [vmem:[%s2921_s1 + $0x188] sm:$0xff]   ;;  %v522_v40 = vor.u32 %v521_v35, %v518_v34  ;;  %v536_v42 = vor.u32 %v535_v38, %v532_v36  ;;  %v2554_v34 = vld [vmem:[%s2921_s1 + $0xe0] sm:$0xff]  }
  0x35   : > { %2377 = vmatprep.subr.bf16.mxu0 %v2519_v44  ;;  %v541_v43 = vrot.slane %v539_v32, 5  ;;  %v2123_v32 = vld [vmem:[%s2651_s14 + $0x8] sm:$0xf]  ;;  %v2555_v35 = vld [vmem:[%s2921_s1 + $0x1e0] sm:$0xff]  }
  0x36   : > { %v523_v45 = vrot.slane %v522_v40, 4  ;;  %v537_v48 = vrot.slane %v536_v42, 4  ;;  %v1484_v36 = vshrl.u32 %v2123_v32, 16  ;;  %v2556_v40 = vld [vmem:[%s2921_s1 + $0xe8] sm:$0xff]  }
  0x37   : > { %2298 = vmatpush3.bf16.msra.mxu1 %v2518_v41  ;;  %v527_v41 = vrot.slane %v525_v28, 5  ;;  %v2550_v28 = vld [vmem:[%s2921_s1 + $0xd0] sm:$0xff]  }
  0x38   : > { %2378 = vmatpush3.bf16.msra.mxu0 %v2519_v44  ;;  %2299 = vmatprep.subr.bf16.mxu1 %v2520_v59  ;;  %v2532_v44 = vld [vmem:[%s2921_s1 + $0x90] sm:$0xff]   ;;  %v542_v51 = vsel %vm2712_vm2, %v537_v48, %v541_v43  ;;  %v1486_v42 = vrot.slane %v1484_v36, 4 }
  0x39   : > { %2379 = vmatprep.subr.bf16.mxu0 %v2521_v63  ;;  %v528_v50 = vsel %vm2712_vm2, %v523_v45, %v527_v41  ;;  %v2557_v41 = vld [vmem:[%s2921_s1 + $0x1e8] sm:$0xff]   ;;  %v2126_v48 = vld [vmem:[%s2651_s14 + $0x14] sm:$0x1] }
  0x3a   : > { %v1959_v54 = vcombine.low %v528_v50, %v542_v51  ;;  %v2559_v50 = vld [vmem:[%s2921_s1 + $0x1f0] sm:$0xff]  }
  0x3b   : > { %2300 = vmatpush3.bf16.msra.mxu1 %v2520_v59  ;;  %v558_v59 = vshrl.u32 %v510_v53, 16 }
  0x3c   : > { %2380 = vmatpush3.bf16.msra.mxu0 %v2521_v63  ;;  %2301 = vmatprep.subr.bf16.mxu1 %v2522_v7  ;;  %v511_v63 = vld [vmem:[%s2651_s14 + $0x1c] sm:$0x1] }
  0x3d   : > { %2381 = vmatprep.subr.bf16.mxu0 %v2523_v10  ;;  %v560_v2 = vrot.slane %v558_v59, 4 }
  0x3f   : > { %2302 = vmatpush3.bf16.msra.mxu1 %v2522_v7  ;;  %v567_v7 = vshll.u32 %v511_v63, 16  ;;  %v564_v9 = vor.u32 %v563_v3, %v560_v2  ;;  %v2567_v3 = vld [vmem:[%s2921_s1 + $0x208] sm:$0xff]  }
  0x40   : > { %2382 = vmatpush3.bf16.msra.mxu0 %v2523_v10  ;;  %2303 = vmatprep.subr.bf16.mxu1 %v2524_v11  ;;  %v2540_v10 = vld [vmem:[%s2921_s1 + $0xb0] sm:$0xff]  }
  0x41   : > { %2383 = vmatprep.subr.bf16.mxu0 %v2525_v16  ;;  %v569_v13 = vrot.slane %v567_v7, 5  ;;  %v565_v15 = vrot.slane %v564_v9, 4  ;;  %v2129_v7 = vld [vmem:[%s2651_s14 + $0x20] sm:$0xf]  ;;  %v1515_v9 = vshll.u32 %v2127_v6, 16 }
  0x43   : > { %2304 = vmatpush3.bf16.msra.mxu1 %v2524_v11  ;;  %v2541_v11 = vld [vmem:[%s2921_s1 + $0x1b0] sm:$0xff]  }
  0x44   : > { %2384 = vmatpush3.bf16.msra.mxu0 %v2525_v16  ;;  %2309 = vmatprep.subr.bf16.mxu1 %v2527_v17  ;;  %v2542_v16 = vld [vmem:[%s2921_s1 + $0xb8] sm:$0xff]  }
  0x45   : > { %2389 = vmatprep.subr.bf16.mxu0 %v2528_v18 }
  0x46   : > { %2306 = vmatmul.mubr.bf16.vlgmr.msra.gmra.mrb[0].mxu1 %v2529_v19  ;;  %v570_v19 = vsel %vm2712_vm2, %v565_v15, %v569_v13  ;;  %v1514_v13 = vrot.slane %v1512_v8, 4 }
  0x47   : > { %2310 = vmatpush3.bf16.msra.mxu1 %v2527_v17  ;;  %2386 = vmatmul.mubr.bf16.vlgmr.msra.gmra.mrb[0].mxu0 %v2054_v30  ;;  %v2543_v17 = vld [vmem:[%s2921_s1 + $0x1b8] sm:$0xff]  }
  0x48   : > { %2390 = vmatpush3.bf16.msra.mxu0 %v2528_v18  ;;  %2311 = vmatprep.subr.bf16.mxu1 %v2530_v33  ;;  %v556_v18 = vsel %vm2712_vm2, %v551_v14, %v555_v12  ;;  %v2552_v30 = vld [vmem:[%s2921_s1 + $0xd8] sm:$0xff]   ;;  %v2570_v12 = vld [vmem:[%s2921_s1 + $0x220] sm:$0xff]   ;;  %v1517_v14 = vrot.slane %v1515_v9, 5 }
  0x49   : > { %2391 = vmatprep.subr.bf16.mxu0 %v2531_v37  ;;  %2405 = vmatprep.mubr.bf16.mxu0 %v2545_v39  ;;  %v1960_v22 = vcombine.low %v556_v18, %v570_v19  ;;  %v2128_v18 = vld [vmem:[%s2651_s14 + $0x1c] sm:$0x1]  ;;  %v2130_v19 = vld [vmem:[%s2651_s14 + $0x24] sm:$0x1] }
  0x4a   : > { %2325 = vmatprep.mubr.bf16.mxu1 %v1959_v54  ;;  %v1507_v54 = vshll.u32 %v2126_v48, 16 }
  0x4b   : > { %2312 = vmatpush3.bf16.msra.mxu1 %v2530_v33  ;;  %v2125_v33 = vld [vmem:[%s2651_s14 + $0x10] sm:$0xf] }
  0x4c   : > { %2392 = vmatpush3.bf16.msra.mxu0 %v2531_v37  ;;  %2313 = vmatprep.subr.bf16.mxu1 %v2532_v44  ;;  %v1487_v37 = vshll.u32 %v2123_v32, 16  ;;  %v1498_v38 = vshrl.u32 %v2125_v33, 16  ;;  %v1501_v39 = vshll.u32 %v2125_v33, 16  ;;  %v1509_v60 = vrot.slane %v1507_v54, 5 }
  0x4d   : > { %2393 = vmatprep.subr.bf16.mxu0 %v2533_v46 }
  0x4e   : > { %v1489_v43 = vrot.slane %v1487_v37, 5  ;;  %v1503_v45 = vrot.slane %v1501_v39, 5  ;;  %v1697_v37 = vlaneseq }
  0x4f   : > { %2314 = vmatpush3.bf16.msra.mxu1 %v2532_v44  ;;  %v1500_v44 = vrot.slane %v1498_v38, 4 }
  0x50   : > { %2394 = vmatpush3.bf16.msra.mxu0 %v2533_v46  ;;  %2315 = vmatprep.subr.bf16.mxu1 %v2534_v49  ;;  %v2124_v46 = vld [vmem:[%s2651_s14 + $0xc] sm:$0x1]  ;;  %v1490_v51 = vor.u32 %v1489_v43, %v1486_v42  ;;  %v1698_v38 = vshrl.u32 %v1697_v37, 7  ;;  %s2163_s14 = sshll.u32 %s2928_s16, 4 }
  0x51   : > { %2395 = vmatprep.subr.bf16.mxu0 %v2535_v55  ;;  %v1493_v52 = vshll.u32 %v2124_v46, 16  ;;  %v1504_v53 = vor.u32 %v1503_v45, %v1500_v44  ;;  %s208_s28 = scalar_lea.vmem %s2922_s2, %s2163_s14 }
  0x52   : > { %v1491_v57 = vrot.slane %v1490_v51, 4  ;;  %v1700_v39 = vadd.s32 16, %v1698_v38  ;;  %v1701_v42 = vadd.s32 24, %v1698_v38 }
  0x53   : > { %2316 = vmatpush3.bf16.msra.mxu1 %v2534_v49  ;;  %v2558_v49 = vld [vmem:[%s2921_s1 + $0xf0] sm:$0xff]   ;;  %v1495_v58 = vrot.slane %v1493_v52, 5  ;;  %v1505_v59 = vrot.slane %v1504_v53, 4 }
  0x54   : > { %2396 = vmatpush3.bf16.msra.mxu0 %v2535_v55  ;;  %2317 = vmatprep.subr.bf16.mxu1 %v2536_v56  ;;  %v2560_v55 = vld [vmem:[%s2921_s1 + $0xf8] sm:$0xff]   ;;  %v1720_v43 = vand.u32 7, %v1700_v39  ;;  %v1727_v48 = vand.u32 7, %v1701_v42 }
  0x55   : > { %2397 = vmatprep.subr.bf16.mxu0 %v2537_v61  ;;  %v1496_v62 = vsel %vm2712_vm2, %v1491_v57, %v1495_v58  ;;  %v1510_v63 = vsel %vm2712_vm2, %v1505_v59, %v1509_v60 }
  0x56   : > { %v2147_v2 = vcombine.low %v1496_v62, %v1510_v63  ;;  %vm1752_vm4 = vcmp.lt.s32.totalorder %v1720_v43, 4  ;;  %vm1753_vm6 = vcmp.lt.s32.totalorder %v1727_v48, 4 }
  0x57   : > { %2318 = vmatpush3.bf16.msra.mxu1 %v2536_v56  ;;  %v2561_v56 = vld [vmem:[%s2921_s1 + $0x1f8] sm:$0xff]  }
  0x58   : > { %2398 = vmatpush3.bf16.msra.mxu0 %v2537_v61  ;;  %2319 = vmatprep.subr.bf16.mxu1 %v2538_v4  ;;  %v2565_v61 = vld [vmem:[%s2921_s1 + $0x200] sm:$0xff]  }
  0x59   : > { %2399 = vmatprep.subr.bf16.mxu0 %v2539_v5 }
  0x5b   : > { %2320 = vmatpush3.bf16.msra.mxu1 %v2538_v4  ;;  %v2568_v4 = vld [vmem:[%s2921_s1 + $0x210] sm:$0xff]  }
  0x5c   : > { %2400 = vmatpush3.bf16.msra.mxu0 %v2539_v5  ;;  %2321 = vmatprep.subr.bf16.mxu1 %v2540_v10  ;;  %v2569_v5 = vld [vmem:[%s2921_s1 + $0x218] sm:$0xff]  }
  0x5d   : > { %2401 = vmatprep.subr.bf16.mxu0 %v2541_v11 }
  0x5f   : > { %2322 = vmatpush3.bf16.msra.mxu1 %v2540_v10  ;;  %v1526_v10 = vshrl.u32 %v2129_v7, 16 }
  0x60   : > { %2402 = vmatpush3.bf16.msra.mxu0 %v2541_v11  ;;  %2323 = vmatprep.subr.bf16.mxu1 %v2542_v16  ;;  %v1529_v11 = vshll.u32 %v2129_v7, 16 }
  0x61   : > { %2403 = vmatprep.subr.bf16.mxu0 %v2543_v17  ;;  %v1528_v15 = vrot.slane %v1526_v10, 4 }
  0x63   : > { %2324 = vmatpush3.bf16.msra.mxu1 %v2542_v16  ;;  %v1531_v16 = vrot.slane %v1529_v11, 5 }
  0x64   : > { %2404 = vmatpush3.bf16.msra.mxu0 %v2543_v17  ;;  %2329 = vmatprep.subr.bf16.mxu1 %v2544_v20  ;;  %v2571_v17 = vld [vmem:[%s2921_s1 + $0x228] sm:$0xff]  }
  0x65   : > { %2409 = vmatprep.subr.bf16.mxu0 %v2546_v21 }
  0x66   : > { %2326 = vmatmul.mubr.bf16.vlgmr.msra.gmra.mrb[0].mxu1 %v1960_v22  ;;  %v1532_v22 = vor.u32 %v1531_v16, %v1528_v15 }
  0x67   : > { %2330 = vmatpush3.bf16.msra.mxu1 %v2544_v20  ;;  %2406 = vmatmul.mubr.bf16.vlgmr.msra.gmra.mrb[0].mxu0 %v2547_v23  ;;  %v1518_v20 = vor.u32 %v1517_v14, %v1514_v13  ;;  %v1535_v23 = vshll.u32 %v2130_v19, 16 }
  0x68   : > { %2410 = vmatpush3.bf16.msra.mxu0 %v2546_v21  ;;  %2331 = vmatprep.subr.bf16.mxu1 %v2548_v24  ;;  %v1521_v21 = vshll.u32 %v2128_v18, 16 }
  0x69   : > { %2411 = vmatprep.subr.bf16.mxu0 %v2549_v25  ;;  %2345 = vmatprep.mubr.bf16.mxu1 %v2562_v26 }
  0x6a   : > { %2425 = vmatprep.mubr.bf16.mxu0 %v2564_v27  ;;  %v1523_v26 = vrot.slane %v1521_v21, 5  ;;  %v1533_v27 = vrot.slane %v1532_v22, 4 }
  0x6b   : > { %2332 = vmatpush3.bf16.msra.mxu1 %v2548_v24  ;;  %v2572_v24 = vld [vmem:[%s2921_s1 + $0x230] sm:$0xff]  }
  0x6c   : > { %2412 = vmatpush3.bf16.msra.mxu0 %v2549_v25  ;;  %2333 = vmatprep.subr.bf16.mxu1 %v2550_v28  ;;  %v1519_v25 = vrot.slane %v1518_v20, 4 }
  0x6d   : > { %2413 = vmatprep.subr.bf16.mxu0 %v2551_v29 }
  0x6f   : > { %2334 = vmatpush3.bf16.msra.mxu1 %v2550_v28  ;;  %v1537_v28 = vrot.slane %v1535_v23, 5 }
  0x70   : > { %2414 = vmatpush3.bf16.msra.mxu0 %v2551_v29  ;;  %2335 = vmatprep.subr.bf16.mxu1 %v2552_v30  ;;  %v2573_v29 = vld [vmem:[%s2921_s1 + $0x238] sm:$0xff]  }
  0x71   : > { %2415 = vmatprep.subr.bf16.mxu0 %v2553_v31 }
  0x73   : > { %2336 = vmatpush3.bf16.msra.mxu1 %v2552_v30  ;;  %v1524_v30 = vsel %vm2712_vm2, %v1519_v25, %v1523_v26 }
  0x74   : > { %2416 = vmatpush3.bf16.msra.mxu0 %v2553_v31  ;;  %2337 = vmatprep.subr.bf16.mxu1 %v2554_v34  ;;  %v1538_v31 = vsel %vm2712_vm2, %v1533_v27, %v1537_v28 }
  0x75   : > { %2417 = vmatprep.subr.bf16.mxu0 %v2555_v35  ;;  %v2148_v32 = vcombine.low %v1524_v30, %v1538_v31 }
  0x77   : > { %2338 = vmatpush3.bf16.msra.mxu1 %v2554_v34 }
  0x78   : > { %2418 = vmatpush3.bf16.msra.mxu0 %v2555_v35  ;;  %2339 = vmatprep.subr.bf16.mxu1 %v2556_v40 }
  0x79   : > { %2419 = vmatprep.subr.bf16.mxu0 %v2557_v41 }
  0x7b   : > { %2340 = vmatpush3.bf16.msra.mxu1 %v2556_v40  ;;  %v1699_v40 = vadd.s32 8, %v1698_v38 }
  0x7c   : > { %2420 = vmatpush3.bf16.msra.mxu0 %v2557_v41  ;;  %2341 = vmatprep.subr.bf16.mxu1 %v2558_v49  ;;  %v1706_v41 = vand.u32 7, %v1698_v38 }
  0x7d   : > { %2421 = vmatprep.subr.bf16.mxu0 %v2559_v50  ;;  %v1713_v44 = vand.u32 7, %v1699_v40 }
  0x7e   : > { %vm1750_vm3 = vcmp.lt.s32.totalorder %v1706_v41, 4 }
  0x7f   : > { %2342 = vmatpush3.bf16.msra.mxu1 %v2558_v49  ;;  %vm1751_vm5 = vcmp.lt.s32.totalorder %v1713_v44, 4 }
  0x80   : > { %2422 = vmatpush3.bf16.msra.mxu0 %v2559_v50  ;;  %2343 = vmatprep.subr.bf16.mxu1 %v2560_v55 }
  0x81   : > { %2423 = vmatprep.subr.bf16.mxu0 %v2561_v56 }
  0x83   : > { %2344 = vmatpush3.bf16.msra.mxu1 %v2560_v55 }
  0x84   : > { %2424 = vmatpush3.bf16.msra.mxu0 %v2561_v56 }
  0x85   : > { %2429 = vmatprep.subr.bf16.mxu0 %v2565_v61 }
  0x86   : > { %2346 = vmatmul.mubr.bf16.vlgmr.msra.gmra.mrb[0].mxu1 %v2563_v0 }
  0x87   : > { %2426 = vmatmul.mubr.bf16.vlgmr.msra.gmra.mrb[0].mxu0 %v2566_v1 }
  0x88   : > { %2430 = vmatpush3.bf16.msra.mxu0 %v2565_v61  ;;  %2445 = vmatprep.mubr.bf16.mxu0 %v2147_v2 }
  0x89   : > { %2431 = vmatprep.subr.bf16.mxu0 %v2567_v3 }
  0x8c   : > { %2432 = vmatpush3.bf16.msra.mxu0 %v2567_v3 }
  0x8d   : > { %2433 = vmatprep.subr.bf16.mxu0 %v2568_v4 }
  0x90   : > { %2434 = vmatpush3.bf16.msra.mxu0 %v2568_v4 }
  0x91   : > { %2435 = vmatprep.subr.bf16.mxu0 %v2569_v5 }
  0x94   : > { %2436 = vmatpush3.bf16.msra.mxu0 %v2569_v5 }
  0x95   : > { %2437 = vmatprep.subr.bf16.mxu0 %v2570_v12 }
  0x98   : > { %2438 = vmatpush3.bf16.msra.mxu0 %v2570_v12 }
  0x99   : > { %2439 = vmatprep.subr.bf16.mxu0 %v2571_v17 }
  0x9c   : > { %2440 = vmatpush3.bf16.msra.mxu0 %v2571_v17 }
  0x9d   : > { %2441 = vmatprep.subr.bf16.mxu0 %v2572_v24 }
  0xa0   : > { %2442 = vmatpush3.bf16.msra.mxu0 %v2572_v24 }
  0xa1   : > { %2443 = vmatprep.subr.bf16.mxu0 %v2573_v29 }
  0xa4   : > { %2444 = vmatpush3.bf16.msra.mxu0 %v2573_v29 }
  0xa7   : > { %2446 = vmatmul.mubr.bf16.vlgmr.msra.gmra.mrb[0].mxu0 %v2148_v32 }
 0x159   : > { %v2347_v33 = vpop.f32.mrb[0].mxu1 }
 0x15a   : > { %v825_v34 = vpop.f32.mrb[1].mxu1 }
 0x15b   : > { %v2348_v35 = vpop.f32.mrb[2].mxu1 }
 0x15c   : > { %v828_v36 = vpop.f32.mrb[3].mxu1 }
 0x17a   : > { %v2447_v45 = vpop.f32.mrb[0].mxu0 }
 0x17b   : > { %v2449_v47 = vadd.f32 %v2447_v45, %v2347_v33  ;;  %v1650_v46 = vpop.f32.mrb[1].mxu0 }
 0x17c   : > { %v2450_v49 = vadd.f32 %v1650_v46, %v825_v34  ;;  %v2448_v50 = vpop.f32.mrb[2].mxu0 }
 0x17d   : > { %v2451_v51 = vadd.f32 %v2448_v50, %v2348_v35  ;;  %v1653_v52 = vpop.f32.mrb[3].mxu0  ;;  %v1764_v56 = vsel %vm1752_vm4, %v2449_v47, 0.0 }
 0x17e   : > { %v1762_v53 = vsel %vm1750_vm3, %v2450_v49, 0.0  ;;  %v2452_v54 = vadd.f32 %v1653_v52, %v828_v36  ;;  %v1778_v63 = vmul.f32 %v1764_v56, %v1764_v56 }
 0x17f   : > { %v2176_v55 = vpack.c.bf16 %v2451_v51, %v2449_v47  ;;  %v1776_v59 = vmul.f32 %v1762_v53, %v1762_v53  ;;  %v1765_v62 = vsel %vm1753_vm6, %v2451_v51, 0.0 }
 0x180   : > { %v2171_v57 = vpack.c.bf16 %v2452_v54, %v2450_v49  ;;  %v1763_v58 = vsel %vm1751_vm5, %v2452_v54, 0.0  ;;  %v1779_v2 = vmul.f32 %v1765_v62, %v1765_v62 }
 0x181   : > { %2178 = vst [vmem:[%s208_s28 + $0x8] sm:$0xff] %v2176_v55   ;;  %v1766_v60 = vadd.f32 %v1763_v58, %v1762_v53  ;;  %v1777_v61 = vmul.f32 %v1763_v58, %v1763_v58 }
 0x182   : > { %2172 = vst [vmem:[%s208_s28] sm:$0xff] %v2171_v57  }
 0x183   : > { %v1767_v0 = vadd.f32 %v1766_v60, %v1764_v56  ;;  %v1780_v1 = vadd.f32 %v1777_v61, %v1776_v59 }
 0x185   : > { %v1768_v3 = vadd.f32 %v1767_v0, %v1765_v62  ;;  %v1781_v4 = vadd.f32 %v1780_v1, %v1778_v63 }
 0x187   : > { %v1769_v5 = vrot.slane %v1768_v3, 4  ;;  %v1782_v6 = vadd.f32 %v1781_v4, %v1779_v2 }
 0x189   : > { %v1770_v7 = vadd.f32 %v1769_v5, %v1768_v3  ;;  %v1783_v8 = vrot.slane %v1782_v6, 4 }
 0x18b   : > { %v1771_v9 = vrot.slane %v1770_v7, 2  ;;  %v1784_v10 = vadd.f32 %v1783_v8, %v1782_v6 }
 0x18d   : > { %v1772_v11 = vadd.f32 %v1771_v9, %v1770_v7  ;;  %v1785_v12 = vrot.slane %v1784_v10, 2 }
 0x18f   : > { %v1773_v13 = vrot.slane %v1772_v11, 1  ;;  %v1786_v14 = vadd.f32 %v1785_v12, %v1784_v10 }
 0x191   : > { %v1774_v15 = vadd.f32 %v1773_v13, %v1772_v11  ;;  %v1787_v16 = vrot.slane %v1786_v14, 1 }
 0x193   : > { %1775 = vst [vmem:[%s211_s5] sm:$0x1] %v1774_v15  ;;  %v1788_v17 = vadd.f32 %v1787_v16, %v1786_v14 }
 0x195   : > { %1789 = vst [vmem:[%s214_s8] sm:$0x1] %v1788_v17 }
 0x196 PF: > { %s15_s15 = sadd.s32 1, %s2580_s15  }
 0x197   : > { %p12_p4 = scmp.ge.s32.totalorder %s15_s15, 4  }
 0x199   :  { %14 = sbr.rel (!%p12_p4) target bundleno = 1 (0x1), region = 95 }

</bundles_post_ra>
